<compile_context>
chip_gen: v6e
topology: v6e:2x2x1
jax: 0.10.0
libtpu: 0.0.40
codegen_flags: <defaults>
</compile_context>

<pallas_src>
import functools

import jax
import jax.numpy as jnp
from jax.experimental import pallas as pl
from jax.experimental.pallas import tpu as pltpu


# ------------------------------ fused kernel --------------------------------

def _fused_vit_kernel(cp_ref,                      # scalar-prefetch (SMEM)
                      x_ref, pos_ref, pw_ref, pb_ref,
                      ln1g_ref, ln1b_ref, qkvw_ref, outw_ref, outb_ref,
                      ln2g_ref, ln2b_ref, w1_ref, b1_ref, w2_ref, b2_ref,
                      hg_ref, hb_ref, hw_ref, hbias_ref,
                      o_ref,
                      *, depth, heads, dim_head, scale):
    f32 = jnp.float32
    bf16 = jnp.bfloat16
    N = x_ref.shape[1]
    inner = heads * dim_head

    def layernorm(x, g, b):
        # nn.LayerNorm: biased variance, eps=1e-5 (PyTorch default), f32 math.
        mu = jnp.mean(x, axis=-1, keepdims=True)
        xc = x - mu
        var = jnp.mean(xc * xc, axis=-1, keepdims=True)
        return xc * jax.lax.rsqrt(var + 1e-5) * g + b

    def gelu(x):
        # tanh-approx GELU: routes through the EUP instead of ~10 VALU ops.
        # TODO(synk): switch to exact erf if/when a Mosaic EUP erf lowering is
        # guaranteed (tanh approx differs from PyTorch nn.GELU() by ~1e-3 max).
        return 0.5 * x * (1.0 + jnp.tanh(0.7978845608028654 *
                                         (x + 0.044715 * x * x * x)))

    # patch_to_embedding + positional embedding  (emb_dropout = 0 -> identity)
    x = x_ref[0]                                           # (N, band) f32
    h = jnp.dot(x.astype(bf16), pw_ref[...],
                preferred_element_type=f32) + pb_ref[...]  # (N, dim) f32
    h = h + pos_ref[0]

    for l in range(depth):                                 # static unroll
        # ---- Residual(PreNorm(Attention)) ----
        xn = layernorm(h, ln1g_ref[l], ln1b_ref[l])
        qkv = jnp.dot(xn.astype(bf16), qkvw_ref[l],
                      preferred_element_type=f32)          # (N, 3*inner) f32
        heads_out = []
        for hh in range(heads):                            # static unroll
            s0 = hh * dim_head
            q = qkv[:, s0:s0 + dim_head] * scale           # fold scale into q
            k = qkv[:, inner + s0:inner + s0 + dim_head]
            v = qkv[:, 2 * inner + s0:2 * inner + s0 + dim_head]
            dots = jax.lax.dot_general(
                q.astype(bf16), k.astype(bf16),
                (((1,), (1,)), ((), ())),
                preferred_element_type=f32)                # (N, N) f32
            m = jnp.max(dots, axis=-1, keepdims=True)
            e = jnp.exp(dots - m)
            p = e * pl.reciprocal(jnp.sum(e, axis=-1, keepdims=True),
                                  approx=True)
            heads_out.append(jnp.dot(p.astype(bf16), v.astype(bf16),
                                     preferred_element_type=f32))
        att = jnp.concatenate(heads_out, axis=-1)          # (N, inner)
        h = h + (jnp.dot(att.astype(bf16), outw_ref[l],
                         preferred_element_type=f32) + outb_ref[l])

        # ---- Residual(PreNorm(FeedForward)) ----
        xn = layernorm(h, ln2g_ref[l], ln2b_ref[l])
        f1 = jnp.dot(xn.astype(bf16), w1_ref[l],
                     preferred_element_type=f32) + b1_ref[l]
        f1 = gelu(f1)
        h = h + (jnp.dot(f1.astype(bf16), w2_ref[l],
                         preferred_element_type=f32) + b2_ref[l])

    # Gather the center token FIRST (one-hot matmul = exact row select, avoids
    # a dynamic VMEM slice), then run the mlp_head on that single row in f32.
    c = cp_ref[pl.program_id(0)]
    sel = (jax.lax.broadcasted_iota(jnp.int32, (1, N), 1) == c).astype(f32)
    hc = jnp.dot(sel, h, preferred_element_type=f32)       # (1, dim)
    y = layernorm(hc, hg_ref[...], hb_ref[...])
    o_ref[0] = (jnp.dot(y, hw_ref[...], preferred_element_type=f32)
                + hbias_ref[...])


# ------------------------------- parameters ---------------------------------

def init_params(key, band, num_token, num_classes, dim, depth, heads,
                dim_head, mlp_dim):
    inner = heads * dim_head
    ks = jax.random.split(key, 3 + depth)

    def nrm(k, shape, scale=0.05):
        return (scale * jax.random.normal(k, shape)).astype(jnp.float32)

    qkv_w, out_w, ff_w1, ff_w2 = [], [], [], []
    for l in range(depth):
        lk = jax.random.split(ks[3 + l], 4)
        qkv_w.append(nrm(lk[0], (dim, 3 * inner)))   # to_qkv (no bias)
        out_w.append(nrm(lk[1], (inner, dim)))
        ff_w1.append(nrm(lk[2], (dim, mlp_dim)))
        ff_w2.append(nrm(lk[3], (mlp_dim, dim)))

    bf16 = jnp.bfloat16
    return dict(
        pos_embedding=nrm(ks[0], (1, num_token, dim), 1.0),
        patch_w=nrm(ks[1], (band, dim)).astype(bf16),
        patch_b=jnp.zeros((1, dim), jnp.float32),
        ln1_g=jnp.ones((depth, 1, dim), jnp.float32),
        ln1_b=jnp.zeros((depth, 1, dim), jnp.float32),
        qkv_w=jnp.stack(qkv_w).astype(bf16),          # (depth, dim, 3*inner)
        out_w=jnp.stack(out_w).astype(bf16),          # (depth, inner, dim)
        out_b=jnp.zeros((depth, 1, dim), jnp.float32),
        ln2_g=jnp.ones((depth, 1, dim), jnp.float32),
        ln2_b=jnp.zeros((depth, 1, dim), jnp.float32),
        ff_w1=jnp.stack(ff_w1).astype(bf16),          # (depth, dim, mlp_dim)
        ff_b1=jnp.zeros((depth, 1, mlp_dim), jnp.float32),
        ff_w2=jnp.stack(ff_w2).astype(bf16),          # (depth, mlp_dim, dim)
        ff_b2=jnp.zeros((depth, 1, dim), jnp.float32),
        head_ln_g=jnp.ones((1, dim), jnp.float32),
        head_ln_b=jnp.zeros((1, dim), jnp.float32),
        head_w=nrm(ks[2], (dim, num_classes)),        # head kept in f32
        head_b=jnp.zeros((1, num_classes), jnp.float32),
    )


# --------------------------------- forward ----------------------------------

def vit_forward(params, x, center_pos, degree=None, mask=None, *,
                heads, dim_head):
    # degree / dis / D2 / edge feed only dead computations in the PyTorch
    # forward, and mask=None skips masking, so they do not affect the output.
    del degree, mask
    B, N, band = x.shape
    depth = params['qkv_w'].shape[0]
    dim = params['head_w'].shape[0]
    num_classes = params['head_w'].shape[1]
    inner = heads * dim_head
    mlp_dim = params['ff_w1'].shape[-1]
    scale = dim_head ** (-0.5)

    kernel = functools.partial(_fused_vit_kernel, depth=depth, heads=heads,
                               dim_head=dim_head, scale=scale)

    # Full-extent blocks for weights (constant index_map => fetched once and
    # kept VMEM-resident across the batch grid); x / output are per-batch.
    w3 = lambda: pl.BlockSpec(None, None)  # placeholder (not used)
    del w3

    def const2(shape):
        return pl.BlockSpec(shape, lambda b, cp: (0, 0))

    def const3(shape):
        return pl.BlockSpec(shape, lambda b, cp: (0, 0, 0))

    grid_spec = pltpu.PrefetchScalarGridSpec(
        num_scalar_prefetch=1,
        grid=(B,),
        in_specs=[
            pl.BlockSpec((1, N, band), lambda b, cp: (b, 0, 0)),   # x
            const3((1, N, dim)),                                   # pos
            const2((band, dim)),                                   # patch_w
            const2((1, dim)),                                      # patch_b
            const3((depth, 1, dim)),                               # ln1_g
            const3((depth, 1, dim)),                               # ln1_b
            const3((depth, dim, 3 * inner)),                       # qkv_w
            const3((depth, inner, dim)),                           # out_w
            const3((depth, 1, dim)),                               # out_b
            const3((depth, 1, dim)),                               # ln2_g
            const3((depth, 1, dim)),                               # ln2_b
            const3((depth, dim, mlp_dim)),                         # ff_w1
            const3((depth, 1, mlp_dim)),                           # ff_b1
            const3((depth, mlp_dim, dim)),                         # ff_w2
            const3((depth, 1, dim)),                               # ff_b2
            const2((1, dim)),                                      # head_ln_g
            const2((1, dim)),                                      # head_ln_b
            const2((dim, num_classes)),                            # head_w
            const2((1, num_classes)),                              # head_b
        ],
        out_specs=pl.BlockSpec((1, 1, num_classes), lambda b, cp: (b, 0, 0)),
    )

    out = pl.pallas_call(
        kernel,
        out_shape=jax.ShapeDtypeStruct((B, 1, num_classes), jnp.float32),
        grid_spec=grid_spec,
        compiler_params=pltpu.CompilerParams(
            # "parallel" batch axis -> shards across v7x's 2 TensorCores;
            # VMEM footprint is KB-scale, well under v7x's 64 MiB.
            dimension_semantics=("parallel",)),
    )(
        center_pos.astype(jnp.int32),
        x.astype(jnp.float32),
        params['pos_embedding'][:, :N],
        params['patch_w'], params['patch_b'],
        params['ln1_g'], params['ln1_b'],
        params['qkv_w'], params['out_w'], params['out_b'],
        params['ln2_g'], params['ln2_b'],
        params['ff_w1'], params['ff_b1'], params['ff_w2'], params['ff_b2'],
        params['head_ln_g'], params['head_ln_b'],
        params['head_w'], params['head_b'],
    )
    # (PyTorch allocates float64 here; JAX x64 disabled -> float32)
    return out[:, 0, :]


# ----------------------------------- main ------------------------------------

if __name__ == "__main__":
    band, num_token, num_classes = 16, 8, 5
    dim, depth, heads, dim_head, mlp_dim = 32, 2, 4, 16, 64
    B = 2

    key = jax.random.PRNGKey(0)
    kp, kx, kc, kd = jax.random.split(key, 4)

    params = init_params(kp, band, num_token, num_classes, dim, depth,
                         heads, dim_head, mlp_dim)
    x = jax.random.normal(kx, (B, num_token, band), dtype=jnp.float32)
    center_pos = jax.random.randint(kc, (B,), 0, num_token, dtype=jnp.int32)
    degree = jax.random.randint(kd, (B, num_token), 0, 10, dtype=jnp.int32)

    fwd = jax.jit(functools.partial(vit_forward, heads=heads,
                                    dim_head=dim_head))
    out = fwd(params, x, center_pos, degree)
    jax.block_until_ready(out)
    assert out.shape == (B, num_classes)
    assert out.dtype == jnp.float32
    print("KERNEL_OK")
</pallas_src>

<mosaic_0001>
module attributes {stable_mosaic.version = 11 : i64} {
  func.func @_fused_vit_kernel(%arg0: i32, %arg1: memref<2xi32, #tpu.memory_space<smem>>, %arg2: memref<1x8x16xf32, #tpu.memory_space<vmem>>, %arg3: memref<1x8x32xf32, #tpu.memory_space<vmem>>, %arg4: memref<16x32xbf16, #tpu.memory_space<vmem>>, %arg5: memref<1x32xf32, #tpu.memory_space<vmem>>, %arg6: memref<2x1x32xf32, #tpu.memory_space<vmem>>, %arg7: memref<2x1x32xf32, #tpu.memory_space<vmem>>, %arg8: memref<2x32x192xbf16, #tpu.memory_space<vmem>>, %arg9: memref<2x64x32xbf16, #tpu.memory_space<vmem>>, %arg10: memref<2x1x32xf32, #tpu.memory_space<vmem>>, %arg11: memref<2x1x32xf32, #tpu.memory_space<vmem>>, %arg12: memref<2x1x32xf32, #tpu.memory_space<vmem>>, %arg13: memref<2x32x64xbf16, #tpu.memory_space<vmem>>, %arg14: memref<2x1x64xf32, #tpu.memory_space<vmem>>, %arg15: memref<2x64x32xbf16, #tpu.memory_space<vmem>>, %arg16: memref<2x1x32xf32, #tpu.memory_space<vmem>>, %arg17: memref<1x32xf32, #tpu.memory_space<vmem>>, %arg18: memref<1x32xf32, #tpu.memory_space<vmem>>, %arg19: memref<32x5xf32, #tpu.memory_space<vmem>>, %arg20: memref<1x5xf32, #tpu.memory_space<vmem>>, %arg21: memref<1x1x5xf32, #tpu.memory_space<vmem>>) attributes {dimension_semantics = [#tpu.dimension_semantics<parallel>], iteration_bounds = array<i64: 2>, scalar_prefetch = 1 : i64, scratch_operands = 0 : i64, tpu.core_type = #tpu.core_type<tc>, window_params = [{transform_indices = @transform_0, window_bounds = array<i64: 1, 8, 16>}, {pipeline_mode = #tpu.pipeline_mode<synchronous>, transform_indices = @transform_1, window_bounds = array<i64: 1, 8, 32>}, {pipeline_mode = #tpu.pipeline_mode<synchronous>, transform_indices = @transform_2, window_bounds = array<i64: 16, 32>}, {pipeline_mode = #tpu.pipeline_mode<synchronous>, transform_indices = @transform_3, window_bounds = array<i64: 1, 32>}, {pipeline_mode = #tpu.pipeline_mode<synchronous>, transform_indices = @transform_4, window_bounds = array<i64: 2, 1, 32>}, {pipeline_mode = #tpu.pipeline_mode<synchronous>, transform_indices = @transform_5, window_bounds = array<i64: 2, 1, 32>}, {pipeline_mode = #tpu.pipeline_mode<synchronous>, transform_indices = @transform_6, window_bounds = array<i64: 2, 32, 192>}, {pipeline_mode = #tpu.pipeline_mode<synchronous>, transform_indices = @transform_7, window_bounds = array<i64: 2, 64, 32>}, {pipeline_mode = #tpu.pipeline_mode<synchronous>, transform_indices = @transform_8, window_bounds = array<i64: 2, 1, 32>}, {pipeline_mode = #tpu.pipeline_mode<synchronous>, transform_indices = @transform_9, window_bounds = array<i64: 2, 1, 32>}, {pipeline_mode = #tpu.pipeline_mode<synchronous>, transform_indices = @transform_10, window_bounds = array<i64: 2, 1, 32>}, {pipeline_mode = #tpu.pipeline_mode<synchronous>, transform_indices = @transform_11, window_bounds = array<i64: 2, 32, 64>}, {pipeline_mode = #tpu.pipeline_mode<synchronous>, transform_indices = @transform_12, window_bounds = array<i64: 2, 1, 64>}, {pipeline_mode = #tpu.pipeline_mode<synchronous>, transform_indices = @transform_13, window_bounds = array<i64: 2, 64, 32>}, {pipeline_mode = #tpu.pipeline_mode<synchronous>, transform_indices = @transform_14, window_bounds = array<i64: 2, 1, 32>}, {pipeline_mode = #tpu.pipeline_mode<synchronous>, transform_indices = @transform_15, window_bounds = array<i64: 1, 32>}, {pipeline_mode = #tpu.pipeline_mode<synchronous>, transform_indices = @transform_16, window_bounds = array<i64: 1, 32>}, {pipeline_mode = #tpu.pipeline_mode<synchronous>, transform_indices = @transform_17, window_bounds = array<i64: 32, 5>}, {pipeline_mode = #tpu.pipeline_mode<synchronous>, transform_indices = @transform_18, window_bounds = array<i64: 1, 5>}, {transform_indices = @transform_19, window_bounds = array<i64: 1, 1, 5>}]} {
    %c0 = arith.constant 0 : index
    %c0_0 = arith.constant 0 : index
    %c0_1 = arith.constant 0 : index
    %0 = vector.load %arg2[%c0, %c0_0, %c0_1] : memref<1x8x16xf32, #tpu.memory_space<vmem>>, vector<1x8x16xf32>
    %1 = vector.shape_cast %0 : vector<1x8x16xf32> to vector<8x16xf32>
    %2 = arith.truncf %1 : vector<8x16xf32> to vector<8x16xbf16>
    %c0_2 = arith.constant 0 : index
    %c0_3 = arith.constant 0 : index
    %3 = vector.load %arg4[%c0_2, %c0_3] : memref<16x32xbf16, #tpu.memory_space<vmem>>, vector<16x32xbf16>
    %cst = arith.constant dense<0.000000e+00> : vector<8x32xf32>
    %4 = tpu.matmul %2, %3, %cst {dimension_numbers = #tpu.dot_dimension_numbers<[1], [0], [0], [1], [0, 0, 1, 1], [], []>} : vector<8x16xbf16>, vector<16x32xbf16>, vector<8x32xf32> -> vector<8x32xf32>
    %c0_4 = arith.constant 0 : index
    %c0_5 = arith.constant 0 : index
    %5 = vector.load %arg5[%c0_4, %c0_5] : memref<1x32xf32, #tpu.memory_space<vmem>>, vector<1x32xf32>
    %6 = vector.broadcast %5 : vector<1x32xf32> to vector<8x32xf32>
    %7 = arith.addf %4, %6 : vector<8x32xf32>
    %c0_6 = arith.constant 0 : index
    %c0_7 = arith.constant 0 : index
    %c0_8 = arith.constant 0 : index
    %8 = vector.load %arg3[%c0_6, %c0_7, %c0_8] : memref<1x8x32xf32, #tpu.memory_space<vmem>>, vector<1x8x32xf32>
    %9 = vector.shape_cast %8 : vector<1x8x32xf32> to vector<8x32xf32>
    %10 = arith.addf %7, %9 : vector<8x32xf32>
    %c0_9 = arith.constant 0 : index
    %c0_10 = arith.constant 0 : index
    %c0_11 = arith.constant 0 : index
    %11 = vector.load %arg6[%c0_9, %c0_10, %c0_11] : memref<2x1x32xf32, #tpu.memory_space<vmem>>, vector<1x1x32xf32>
    %12 = vector.shape_cast %11 : vector<1x1x32xf32> to vector<1x32xf32>
    %c0_12 = arith.constant 0 : index
    %c0_13 = arith.constant 0 : index
    %c0_14 = arith.constant 0 : index
    %13 = vector.load %arg7[%c0_12, %c0_13, %c0_14] : memref<2x1x32xf32, #tpu.memory_space<vmem>>, vector<1x1x32xf32>
    %14 = vector.shape_cast %13 : vector<1x1x32xf32> to vector<1x32xf32>
    %cst_15 = arith.constant dense<0.000000e+00> : vector<8xf32>
    %15 = vector.multi_reduction <add>, %10, %cst_15 [1] : vector<8x32xf32> to vector<8xf32>
    %16 = vector.shape_cast %15 : vector<8xf32> to vector<8x1xf32>
    %cst_16 = arith.constant 3.200000e+01 : f32
    %17 = vector.broadcast %cst_16 : f32 to vector<8x1xf32>
    %18 = arith.divf %16, %17 : vector<8x1xf32>
    %19 = vector.broadcast %18 : vector<8x1xf32> to vector<8x32xf32>
    %20 = arith.subf %10, %19 : vector<8x32xf32>
    %21 = arith.mulf %20, %20 : vector<8x32xf32>
    %cst_17 = arith.constant dense<0.000000e+00> : vector<8xf32>
    %22 = vector.multi_reduction <add>, %21, %cst_17 [1] : vector<8x32xf32> to vector<8xf32>
    %23 = vector.shape_cast %22 : vector<8xf32> to vector<8x1xf32>
    %cst_18 = arith.constant 3.200000e+01 : f32
    %24 = vector.broadcast %cst_18 : f32 to vector<8x1xf32>
    %25 = arith.divf %23, %24 : vector<8x1xf32>
    %cst_19 = arith.constant 9.99999974E-6 : f32
    %26 = vector.broadcast %cst_19 : f32 to vector<8x1xf32>
    %27 = arith.addf %25, %26 : vector<8x1xf32>
    %28 = math.rsqrt %27 : vector<8x1xf32>
    %29 = vector.broadcast %28 : vector<8x1xf32> to vector<8x32xf32>
    %30 = arith.mulf %20, %29 : vector<8x32xf32>
    %31 = vector.broadcast %12 : vector<1x32xf32> to vector<8x32xf32>
    %32 = arith.mulf %30, %31 : vector<8x32xf32>
    %33 = vector.broadcast %14 : vector<1x32xf32> to vector<8x32xf32>
    %34 = arith.addf %32, %33 : vector<8x32xf32>
    %35 = arith.truncf %34 : vector<8x32xf32> to vector<8x32xbf16>
    %c0_20 = arith.constant 0 : index
    %c0_21 = arith.constant 0 : index
    %c0_22 = arith.constant 0 : index
    %36 = vector.load %arg8[%c0_20, %c0_21, %c0_22] : memref<2x32x192xbf16, #tpu.memory_space<vmem>>, vector<1x32x192xbf16>
    %37 = vector.shape_cast %36 : vector<1x32x192xbf16> to vector<32x192xbf16>
    %cst_23 = arith.constant dense<0.000000e+00> : vector<8x192xf32>
    %38 = tpu.matmul %35, %37, %cst_23 {dimension_numbers = #tpu.dot_dimension_numbers<[1], [0], [0], [1], [0, 0, 1, 1], [], []>} : vector<8x32xbf16>, vector<32x192xbf16>, vector<8x192xf32> -> vector<8x192xf32>
    %39 = vector.extract_strided_slice %38 {offsets = [0, 0], sizes = [8, 16], strides = [1, 1]} : vector<8x192xf32> to vector<8x16xf32>
    %cst_24 = arith.constant 2.500000e-01 : f32
    %40 = vector.broadcast %cst_24 : f32 to vector<8x16xf32>
    %41 = arith.mulf %39, %40 : vector<8x16xf32>
    %42 = vector.extract_strided_slice %38 {offsets = [0, 64], sizes = [8, 16], strides = [1, 1]} : vector<8x192xf32> to vector<8x16xf32>
    %43 = vector.extract_strided_slice %38 {offsets = [0, 128], sizes = [8, 16], strides = [1, 1]} : vector<8x192xf32> to vector<8x16xf32>
    %44 = arith.truncf %41 : vector<8x16xf32> to vector<8x16xbf16>
    %45 = arith.truncf %42 : vector<8x16xf32> to vector<8x16xbf16>
    %cst_25 = arith.constant dense<0.000000e+00> : vector<8x8xf32>
    %46 = tpu.matmul %44, %45, %cst_25 {dimension_numbers = #tpu.dot_dimension_numbers<[1], [1], [0], [0], [0, 0, 1, 0], [], []>} : vector<8x16xbf16>, vector<8x16xbf16>, vector<8x8xf32> -> vector<8x8xf32>
    %cst_26 = arith.constant dense<0xFF800000> : vector<8xf32>
    %47 = vector.multi_reduction <maximumf>, %46, %cst_26 [1] : vector<8x8xf32> to vector<8xf32>
    %48 = vector.shape_cast %47 : vector<8xf32> to vector<8x1xf32>
    %49 = vector.broadcast %48 : vector<8x1xf32> to vector<8x8xf32>
    %50 = arith.subf %46, %49 : vector<8x8xf32>
    %51 = math.exp %50 : vector<8x8xf32>
    %cst_27 = arith.constant dense<0.000000e+00> : vector<8xf32>
    %52 = vector.multi_reduction <add>, %51, %cst_27 [1] : vector<8x8xf32> to vector<8xf32>
    %53 = vector.shape_cast %52 : vector<8xf32> to vector<8x1xf32>
    %54 = tpu.reciprocal %53 {approx = true} : vector<8x1xf32> -> vector<8x1xf32>
    %55 = vector.broadcast %54 : vector<8x1xf32> to vector<8x8xf32>
    %56 = arith.mulf %51, %55 : vector<8x8xf32>
    %57 = arith.truncf %56 : vector<8x8xf32> to vector<8x8xbf16>
    %58 = arith.truncf %43 : vector<8x16xf32> to vector<8x16xbf16>
    %cst_28 = arith.constant dense<0.000000e+00> : vector<8x16xf32>
    %59 = tpu.matmul %57, %58, %cst_28 {dimension_numbers = #tpu.dot_dimension_numbers<[1], [0], [0], [1], [0, 0, 1, 1], [], []>} : vector<8x8xbf16>, vector<8x16xbf16>, vector<8x16xf32> -> vector<8x16xf32>
    %60 = vector.extract_strided_slice %38 {offsets = [0, 16], sizes = [8, 16], strides = [1, 1]} : vector<8x192xf32> to vector<8x16xf32>
    %cst_29 = arith.constant 2.500000e-01 : f32
    %61 = vector.broadcast %cst_29 : f32 to vector<8x16xf32>
    %62 = arith.mulf %60, %61 : vector<8x16xf32>
    %63 = vector.extract_strided_slice %38 {offsets = [0, 80], sizes = [8, 16], strides = [1, 1]} : vector<8x192xf32> to vector<8x16xf32>
    %64 = vector.extract_strided_slice %38 {offsets = [0, 144], sizes = [8, 16], strides = [1, 1]} : vector<8x192xf32> to vector<8x16xf32>
    %65 = arith.truncf %62 : vector<8x16xf32> to vector<8x16xbf16>
    %66 = arith.truncf %63 : vector<8x16xf32> to vector<8x16xbf16>
    %cst_30 = arith.constant dense<0.000000e+00> : vector<8x8xf32>
    %67 = tpu.matmul %65, %66, %cst_30 {dimension_numbers = #tpu.dot_dimension_numbers<[1], [1], [0], [0], [0, 0, 1, 0], [], []>} : vector<8x16xbf16>, vector<8x16xbf16>, vector<8x8xf32> -> vector<8x8xf32>
    %cst_31 = arith.constant dense<0xFF800000> : vector<8xf32>
    %68 = vector.multi_reduction <maximumf>, %67, %cst_31 [1] : vector<8x8xf32> to vector<8xf32>
    %69 = vector.shape_cast %68 : vector<8xf32> to vector<8x1xf32>
    %70 = vector.broadcast %69 : vector<8x1xf32> to vector<8x8xf32>
    %71 = arith.subf %67, %70 : vector<8x8xf32>
    %72 = math.exp %71 : vector<8x8xf32>
    %cst_32 = arith.constant dense<0.000000e+00> : vector<8xf32>
    %73 = vector.multi_reduction <add>, %72, %cst_32 [1] : vector<8x8xf32> to vector<8xf32>
    %74 = vector.shape_cast %73 : vector<8xf32> to vector<8x1xf32>
    %75 = tpu.reciprocal %74 {approx = true} : vector<8x1xf32> -> vector<8x1xf32>
    %76 = vector.broadcast %75 : vector<8x1xf32> to vector<8x8xf32>
    %77 = arith.mulf %72, %76 : vector<8x8xf32>
    %78 = arith.truncf %77 : vector<8x8xf32> to vector<8x8xbf16>
    %79 = arith.truncf %64 : vector<8x16xf32> to vector<8x16xbf16>
    %cst_33 = arith.constant dense<0.000000e+00> : vector<8x16xf32>
    %80 = tpu.matmul %78, %79, %cst_33 {dimension_numbers = #tpu.dot_dimension_numbers<[1], [0], [0], [1], [0, 0, 1, 1], [], []>} : vector<8x8xbf16>, vector<8x16xbf16>, vector<8x16xf32> -> vector<8x16xf32>
    %81 = vector.extract_strided_slice %38 {offsets = [0, 32], sizes = [8, 16], strides = [1, 1]} : vector<8x192xf32> to vector<8x16xf32>
    %cst_34 = arith.constant 2.500000e-01 : f32
    %82 = vector.broadcast %cst_34 : f32 to vector<8x16xf32>
    %83 = arith.mulf %81, %82 : vector<8x16xf32>
    %84 = vector.extract_strided_slice %38 {offsets = [0, 96], sizes = [8, 16], strides = [1, 1]} : vector<8x192xf32> to vector<8x16xf32>
    %85 = vector.extract_strided_slice %38 {offsets = [0, 160], sizes = [8, 16], strides = [1, 1]} : vector<8x192xf32> to vector<8x16xf32>
    %86 = arith.truncf %83 : vector<8x16xf32> to vector<8x16xbf16>
    %87 = arith.truncf %84 : vector<8x16xf32> to vector<8x16xbf16>
    %cst_35 = arith.constant dense<0.000000e+00> : vector<8x8xf32>
    %88 = tpu.matmul %86, %87, %cst_35 {dimension_numbers = #tpu.dot_dimension_numbers<[1], [1], [0], [0], [0, 0, 1, 0], [], []>} : vector<8x16xbf16>, vector<8x16xbf16>, vector<8x8xf32> -> vector<8x8xf32>
    %cst_36 = arith.constant dense<0xFF800000> : vector<8xf32>
    %89 = vector.multi_reduction <maximumf>, %88, %cst_36 [1] : vector<8x8xf32> to vector<8xf32>
    %90 = vector.shape_cast %89 : vector<8xf32> to vector<8x1xf32>
    %91 = vector.broadcast %90 : vector<8x1xf32> to vector<8x8xf32>
    %92 = arith.subf %88, %91 : vector<8x8xf32>
    %93 = math.exp %92 : vector<8x8xf32>
    %cst_37 = arith.constant dense<0.000000e+00> : vector<8xf32>
    %94 = vector.multi_reduction <add>, %93, %cst_37 [1] : vector<8x8xf32> to vector<8xf32>
    %95 = vector.shape_cast %94 : vector<8xf32> to vector<8x1xf32>
    %96 = tpu.reciprocal %95 {approx = true} : vector<8x1xf32> -> vector<8x1xf32>
    %97 = vector.broadcast %96 : vector<8x1xf32> to vector<8x8xf32>
    %98 = arith.mulf %93, %97 : vector<8x8xf32>
    %99 = arith.truncf %98 : vector<8x8xf32> to vector<8x8xbf16>
    %100 = arith.truncf %85 : vector<8x16xf32> to vector<8x16xbf16>
    %cst_38 = arith.constant dense<0.000000e+00> : vector<8x16xf32>
    %101 = tpu.matmul %99, %100, %cst_38 {dimension_numbers = #tpu.dot_dimension_numbers<[1], [0], [0], [1], [0, 0, 1, 1], [], []>} : vector<8x8xbf16>, vector<8x16xbf16>, vector<8x16xf32> -> vector<8x16xf32>
    %102 = vector.extract_strided_slice %38 {offsets = [0, 48], sizes = [8, 16], strides = [1, 1]} : vector<8x192xf32> to vector<8x16xf32>
    %cst_39 = arith.constant 2.500000e-01 : f32
    %103 = vector.broadcast %cst_39 : f32 to vector<8x16xf32>
    %104 = arith.mulf %102, %103 : vector<8x16xf32>
    %105 = vector.extract_strided_slice %38 {offsets = [0, 112], sizes = [8, 16], strides = [1, 1]} : vector<8x192xf32> to vector<8x16xf32>
    %106 = vector.extract_strided_slice %38 {offsets = [0, 176], sizes = [8, 16], strides = [1, 1]} : vector<8x192xf32> to vector<8x16xf32>
    %107 = arith.truncf %104 : vector<8x16xf32> to vector<8x16xbf16>
    %108 = arith.truncf %105 : vector<8x16xf32> to vector<8x16xbf16>
    %cst_40 = arith.constant dense<0.000000e+00> : vector<8x8xf32>
    %109 = tpu.matmul %107, %108, %cst_40 {dimension_numbers = #tpu.dot_dimension_numbers<[1], [1], [0], [0], [0, 0, 1, 0], [], []>} : vector<8x16xbf16>, vector<8x16xbf16>, vector<8x8xf32> -> vector<8x8xf32>
    %cst_41 = arith.constant dense<0xFF800000> : vector<8xf32>
    %110 = vector.multi_reduction <maximumf>, %109, %cst_41 [1] : vector<8x8xf32> to vector<8xf32>
    %111 = vector.shape_cast %110 : vector<8xf32> to vector<8x1xf32>
    %112 = vector.broadcast %111 : vector<8x1xf32> to vector<8x8xf32>
    %113 = arith.subf %109, %112 : vector<8x8xf32>
    %114 = math.exp %113 : vector<8x8xf32>
    %cst_42 = arith.constant dense<0.000000e+00> : vector<8xf32>
    %115 = vector.multi_reduction <add>, %114, %cst_42 [1] : vector<8x8xf32> to vector<8xf32>
    %116 = vector.shape_cast %115 : vector<8xf32> to vector<8x1xf32>
    %117 = tpu.reciprocal %116 {approx = true} : vector<8x1xf32> -> vector<8x1xf32>
    %118 = vector.broadcast %117 : vector<8x1xf32> to vector<8x8xf32>
    %119 = arith.mulf %114, %118 : vector<8x8xf32>
    %120 = arith.truncf %119 : vector<8x8xf32> to vector<8x8xbf16>
    %121 = arith.truncf %106 : vector<8x16xf32> to vector<8x16xbf16>
    %cst_43 = arith.constant dense<0.000000e+00> : vector<8x16xf32>
    %122 = tpu.matmul %120, %121, %cst_43 {dimension_numbers = #tpu.dot_dimension_numbers<[1], [0], [0], [1], [0, 0, 1, 1], [], []>} : vector<8x8xbf16>, vector<8x16xbf16>, vector<8x16xf32> -> vector<8x16xf32>
    %123 = tpu.concatenate %59, %80, %101, %122 in 1 : vector<8x16xf32>, vector<8x16xf32>, vector<8x16xf32>, vector<8x16xf32> -> vector<8x64xf32>
    %124 = arith.truncf %123 : vector<8x64xf32> to vector<8x64xbf16>
    %c0_44 = arith.constant 0 : index
    %c0_45 = arith.constant 0 : index
    %c0_46 = arith.constant 0 : index
    %125 = vector.load %arg9[%c0_44, %c0_45, %c0_46] : memref<2x64x32xbf16, #tpu.memory_space<vmem>>, vector<1x64x32xbf16>
    %126 = vector.shape_cast %125 : vector<1x64x32xbf16> to vector<64x32xbf16>
    %cst_47 = arith.constant dense<0.000000e+00> : vector<8x32xf32>
    %127 = tpu.matmul %124, %126, %cst_47 {dimension_numbers = #tpu.dot_dimension_numbers<[1], [0], [0], [1], [0, 0, 1, 1], [], []>} : vector<8x64xbf16>, vector<64x32xbf16>, vector<8x32xf32> -> vector<8x32xf32>
    %c0_48 = arith.constant 0 : index
    %c0_49 = arith.constant 0 : index
    %c0_50 = arith.constant 0 : index
    %128 = vector.load %arg10[%c0_48, %c0_49, %c0_50] : memref<2x1x32xf32, #tpu.memory_space<vmem>>, vector<1x1x32xf32>
    %129 = vector.shape_cast %128 : vector<1x1x32xf32> to vector<1x32xf32>
    %130 = vector.broadcast %129 : vector<1x32xf32> to vector<8x32xf32>
    %131 = arith.addf %127, %130 : vector<8x32xf32>
    %132 = arith.addf %10, %131 : vector<8x32xf32>
    %c0_51 = arith.constant 0 : index
    %c0_52 = arith.constant 0 : index
    %c0_53 = arith.constant 0 : index
    %133 = vector.load %arg11[%c0_51, %c0_52, %c0_53] : memref<2x1x32xf32, #tpu.memory_space<vmem>>, vector<1x1x32xf32>
    %134 = vector.shape_cast %133 : vector<1x1x32xf32> to vector<1x32xf32>
    %c0_54 = arith.constant 0 : index
    %c0_55 = arith.constant 0 : index
    %c0_56 = arith.constant 0 : index
    %135 = vector.load %arg12[%c0_54, %c0_55, %c0_56] : memref<2x1x32xf32, #tpu.memory_space<vmem>>, vector<1x1x32xf32>
    %136 = vector.shape_cast %135 : vector<1x1x32xf32> to vector<1x32xf32>
    %cst_57 = arith.constant dense<0.000000e+00> : vector<8xf32>
    %137 = vector.multi_reduction <add>, %132, %cst_57 [1] : vector<8x32xf32> to vector<8xf32>
    %138 = vector.shape_cast %137 : vector<8xf32> to vector<8x1xf32>
    %cst_58 = arith.constant 3.200000e+01 : f32
    %139 = vector.broadcast %cst_58 : f32 to vector<8x1xf32>
    %140 = arith.divf %138, %139 : vector<8x1xf32>
    %141 = vector.broadcast %140 : vector<8x1xf32> to vector<8x32xf32>
    %142 = arith.subf %132, %141 : vector<8x32xf32>
    %143 = arith.mulf %142, %142 : vector<8x32xf32>
    %cst_59 = arith.constant dense<0.000000e+00> : vector<8xf32>
    %144 = vector.multi_reduction <add>, %143, %cst_59 [1] : vector<8x32xf32> to vector<8xf32>
    %145 = vector.shape_cast %144 : vector<8xf32> to vector<8x1xf32>
    %cst_60 = arith.constant 3.200000e+01 : f32
    %146 = vector.broadcast %cst_60 : f32 to vector<8x1xf32>
    %147 = arith.divf %145, %146 : vector<8x1xf32>
    %cst_61 = arith.constant 9.99999974E-6 : f32
    %148 = vector.broadcast %cst_61 : f32 to vector<8x1xf32>
    %149 = arith.addf %147, %148 : vector<8x1xf32>
    %150 = math.rsqrt %149 : vector<8x1xf32>
    %151 = vector.broadcast %150 : vector<8x1xf32> to vector<8x32xf32>
    %152 = arith.mulf %142, %151 : vector<8x32xf32>
    %153 = vector.broadcast %134 : vector<1x32xf32> to vector<8x32xf32>
    %154 = arith.mulf %152, %153 : vector<8x32xf32>
    %155 = vector.broadcast %136 : vector<1x32xf32> to vector<8x32xf32>
    %156 = arith.addf %154, %155 : vector<8x32xf32>
    %157 = arith.truncf %156 : vector<8x32xf32> to vector<8x32xbf16>
    %c0_62 = arith.constant 0 : index
    %c0_63 = arith.constant 0 : index
    %c0_64 = arith.constant 0 : index
    %158 = vector.load %arg13[%c0_62, %c0_63, %c0_64] : memref<2x32x64xbf16, #tpu.memory_space<vmem>>, vector<1x32x64xbf16>
    %159 = vector.shape_cast %158 : vector<1x32x64xbf16> to vector<32x64xbf16>
    %cst_65 = arith.constant dense<0.000000e+00> : vector<8x64xf32>
    %160 = tpu.matmul %157, %159, %cst_65 {dimension_numbers = #tpu.dot_dimension_numbers<[1], [0], [0], [1], [0, 0, 1, 1], [], []>} : vector<8x32xbf16>, vector<32x64xbf16>, vector<8x64xf32> -> vector<8x64xf32>
    %c0_66 = arith.constant 0 : index
    %c0_67 = arith.constant 0 : index
    %c0_68 = arith.constant 0 : index
    %161 = vector.load %arg14[%c0_66, %c0_67, %c0_68] : memref<2x1x64xf32, #tpu.memory_space<vmem>>, vector<1x1x64xf32>
    %162 = vector.shape_cast %161 : vector<1x1x64xf32> to vector<1x64xf32>
    %163 = vector.broadcast %162 : vector<1x64xf32> to vector<8x64xf32>
    %164 = arith.addf %160, %163 : vector<8x64xf32>
    %cst_69 = arith.constant 5.000000e-01 : f32
    %165 = vector.broadcast %cst_69 : f32 to vector<8x64xf32>
    %166 = arith.mulf %165, %164 : vector<8x64xf32>
    %cst_70 = arith.constant 4.471500e-02 : f32
    %167 = vector.broadcast %cst_70 : f32 to vector<8x64xf32>
    %168 = arith.mulf %167, %164 : vector<8x64xf32>
    %169 = arith.mulf %168, %164 : vector<8x64xf32>
    %170 = arith.mulf %169, %164 : vector<8x64xf32>
    %171 = arith.addf %164, %170 : vector<8x64xf32>
    %cst_71 = arith.constant 0.797884583 : f32
    %172 = vector.broadcast %cst_71 : f32 to vector<8x64xf32>
    %173 = arith.mulf %172, %171 : vector<8x64xf32>
    %174 = math.tanh %173 : vector<8x64xf32>
    %cst_72 = arith.constant 1.000000e+00 : f32
    %175 = vector.broadcast %cst_72 : f32 to vector<8x64xf32>
    %176 = arith.addf %175, %174 : vector<8x64xf32>
    %177 = arith.mulf %166, %176 : vector<8x64xf32>
    %178 = arith.truncf %177 : vector<8x64xf32> to vector<8x64xbf16>
    %c0_73 = arith.constant 0 : index
    %c0_74 = arith.constant 0 : index
    %c0_75 = arith.constant 0 : index
    %179 = vector.load %arg15[%c0_73, %c0_74, %c0_75] : memref<2x64x32xbf16, #tpu.memory_space<vmem>>, vector<1x64x32xbf16>
    %180 = vector.shape_cast %179 : vector<1x64x32xbf16> to vector<64x32xbf16>
    %cst_76 = arith.constant dense<0.000000e+00> : vector<8x32xf32>
    %181 = tpu.matmul %178, %180, %cst_76 {dimension_numbers = #tpu.dot_dimension_numbers<[1], [0], [0], [1], [0, 0, 1, 1], [], []>} : vector<8x64xbf16>, vector<64x32xbf16>, vector<8x32xf32> -> vector<8x32xf32>
    %c0_77 = arith.constant 0 : index
    %c0_78 = arith.constant 0 : index
    %c0_79 = arith.constant 0 : index
    %182 = vector.load %arg16[%c0_77, %c0_78, %c0_79] : memref<2x1x32xf32, #tpu.memory_space<vmem>>, vector<1x1x32xf32>
    %183 = vector.shape_cast %182 : vector<1x1x32xf32> to vector<1x32xf32>
    %184 = vector.broadcast %183 : vector<1x32xf32> to vector<8x32xf32>
    %185 = arith.addf %181, %184 : vector<8x32xf32>
    %186 = arith.addf %132, %185 : vector<8x32xf32>
    %c1 = arith.constant 1 : index
    %c0_80 = arith.constant 0 : index
    %c0_81 = arith.constant 0 : index
    %187 = vector.load %arg6[%c1, %c0_80, %c0_81] : memref<2x1x32xf32, #tpu.memory_space<vmem>>, vector<1x1x32xf32>
    %188 = vector.shape_cast %187 : vector<1x1x32xf32> to vector<1x32xf32>
    %c1_82 = arith.constant 1 : index
    %c0_83 = arith.constant 0 : index
    %c0_84 = arith.constant 0 : index
    %189 = vector.load %arg7[%c1_82, %c0_83, %c0_84] : memref<2x1x32xf32, #tpu.memory_space<vmem>>, vector<1x1x32xf32>
    %190 = vector.shape_cast %189 : vector<1x1x32xf32> to vector<1x32xf32>
    %cst_85 = arith.constant dense<0.000000e+00> : vector<8xf32>
    %191 = vector.multi_reduction <add>, %186, %cst_85 [1] : vector<8x32xf32> to vector<8xf32>
    %192 = vector.shape_cast %191 : vector<8xf32> to vector<8x1xf32>
    %cst_86 = arith.constant 3.200000e+01 : f32
    %193 = vector.broadcast %cst_86 : f32 to vector<8x1xf32>
    %194 = arith.divf %192, %193 : vector<8x1xf32>
    %195 = vector.broadcast %194 : vector<8x1xf32> to vector<8x32xf32>
    %196 = arith.subf %186, %195 : vector<8x32xf32>
    %197 = arith.mulf %196, %196 : vector<8x32xf32>
    %cst_87 = arith.constant dense<0.000000e+00> : vector<8xf32>
    %198 = vector.multi_reduction <add>, %197, %cst_87 [1] : vector<8x32xf32> to vector<8xf32>
    %199 = vector.shape_cast %198 : vector<8xf32> to vector<8x1xf32>
    %cst_88 = arith.constant 3.200000e+01 : f32
    %200 = vector.broadcast %cst_88 : f32 to vector<8x1xf32>
    %201 = arith.divf %199, %200 : vector<8x1xf32>
    %cst_89 = arith.constant 9.99999974E-6 : f32
    %202 = vector.broadcast %cst_89 : f32 to vector<8x1xf32>
    %203 = arith.addf %201, %202 : vector<8x1xf32>
    %204 = math.rsqrt %203 : vector<8x1xf32>
    %205 = vector.broadcast %204 : vector<8x1xf32> to vector<8x32xf32>
    %206 = arith.mulf %196, %205 : vector<8x32xf32>
    %207 = vector.broadcast %188 : vector<1x32xf32> to vector<8x32xf32>
    %208 = arith.mulf %206, %207 : vector<8x32xf32>
    %209 = vector.broadcast %190 : vector<1x32xf32> to vector<8x32xf32>
    %210 = arith.addf %208, %209 : vector<8x32xf32>
    %211 = arith.truncf %210 : vector<8x32xf32> to vector<8x32xbf16>
    %c1_90 = arith.constant 1 : index
    %c0_91 = arith.constant 0 : index
    %c0_92 = arith.constant 0 : index
    %212 = vector.load %arg8[%c1_90, %c0_91, %c0_92] : memref<2x32x192xbf16, #tpu.memory_space<vmem>>, vector<1x32x192xbf16>
    %213 = vector.shape_cast %212 : vector<1x32x192xbf16> to vector<32x192xbf16>
    %cst_93 = arith.constant dense<0.000000e+00> : vector<8x192xf32>
    %214 = tpu.matmul %211, %213, %cst_93 {dimension_numbers = #tpu.dot_dimension_numbers<[1], [0], [0], [1], [0, 0, 1, 1], [], []>} : vector<8x32xbf16>, vector<32x192xbf16>, vector<8x192xf32> -> vector<8x192xf32>
    %215 = vector.extract_strided_slice %214 {offsets = [0, 0], sizes = [8, 16], strides = [1, 1]} : vector<8x192xf32> to vector<8x16xf32>
    %cst_94 = arith.constant 2.500000e-01 : f32
    %216 = vector.broadcast %cst_94 : f32 to vector<8x16xf32>
    %217 = arith.mulf %215, %216 : vector<8x16xf32>
    %218 = vector.extract_strided_slice %214 {offsets = [0, 64], sizes = [8, 16], strides = [1, 1]} : vector<8x192xf32> to vector<8x16xf32>
    %219 = vector.extract_strided_slice %214 {offsets = [0, 128], sizes = [8, 16], strides = [1, 1]} : vector<8x192xf32> to vector<8x16xf32>
    %220 = arith.truncf %217 : vector<8x16xf32> to vector<8x16xbf16>
    %221 = arith.truncf %218 : vector<8x16xf32> to vector<8x16xbf16>
    %cst_95 = arith.constant dense<0.000000e+00> : vector<8x8xf32>
    %222 = tpu.matmul %220, %221, %cst_95 {dimension_numbers = #tpu.dot_dimension_numbers<[1], [1], [0], [0], [0, 0, 1, 0], [], []>} : vector<8x16xbf16>, vector<8x16xbf16>, vector<8x8xf32> -> vector<8x8xf32>
    %cst_96 = arith.constant dense<0xFF800000> : vector<8xf32>
    %223 = vector.multi_reduction <maximumf>, %222, %cst_96 [1] : vector<8x8xf32> to vector<8xf32>
    %224 = vector.shape_cast %223 : vector<8xf32> to vector<8x1xf32>
    %225 = vector.broadcast %224 : vector<8x1xf32> to vector<8x8xf32>
    %226 = arith.subf %222, %225 : vector<8x8xf32>
    %227 = math.exp %226 : vector<8x8xf32>
    %cst_97 = arith.constant dense<0.000000e+00> : vector<8xf32>
    %228 = vector.multi_reduction <add>, %227, %cst_97 [1] : vector<8x8xf32> to vector<8xf32>
    %229 = vector.shape_cast %228 : vector<8xf32> to vector<8x1xf32>
    %230 = tpu.reciprocal %229 {approx = true} : vector<8x1xf32> -> vector<8x1xf32>
    %231 = vector.broadcast %230 : vector<8x1xf32> to vector<8x8xf32>
    %232 = arith.mulf %227, %231 : vector<8x8xf32>
    %233 = arith.truncf %232 : vector<8x8xf32> to vector<8x8xbf16>
    %234 = arith.truncf %219 : vector<8x16xf32> to vector<8x16xbf16>
    %cst_98 = arith.constant dense<0.000000e+00> : vector<8x16xf32>
    %235 = tpu.matmul %233, %234, %cst_98 {dimension_numbers = #tpu.dot_dimension_numbers<[1], [0], [0], [1], [0, 0, 1, 1], [], []>} : vector<8x8xbf16>, vector<8x16xbf16>, vector<8x16xf32> -> vector<8x16xf32>
    %236 = vector.extract_strided_slice %214 {offsets = [0, 16], sizes = [8, 16], strides = [1, 1]} : vector<8x192xf32> to vector<8x16xf32>
    %cst_99 = arith.constant 2.500000e-01 : f32
    %237 = vector.broadcast %cst_99 : f32 to vector<8x16xf32>
    %238 = arith.mulf %236, %237 : vector<8x16xf32>
    %239 = vector.extract_strided_slice %214 {offsets = [0, 80], sizes = [8, 16], strides = [1, 1]} : vector<8x192xf32> to vector<8x16xf32>
    %240 = vector.extract_strided_slice %214 {offsets = [0, 144], sizes = [8, 16], strides = [1, 1]} : vector<8x192xf32> to vector<8x16xf32>
    %241 = arith.truncf %238 : vector<8x16xf32> to vector<8x16xbf16>
    %242 = arith.truncf %239 : vector<8x16xf32> to vector<8x16xbf16>
    %cst_100 = arith.constant dense<0.000000e+00> : vector<8x8xf32>
    %243 = tpu.matmul %241, %242, %cst_100 {dimension_numbers = #tpu.dot_dimension_numbers<[1], [1], [0], [0], [0, 0, 1, 0], [], []>} : vector<8x16xbf16>, vector<8x16xbf16>, vector<8x8xf32> -> vector<8x8xf32>
    %cst_101 = arith.constant dense<0xFF800000> : vector<8xf32>
    %244 = vector.multi_reduction <maximumf>, %243, %cst_101 [1] : vector<8x8xf32> to vector<8xf32>
    %245 = vector.shape_cast %244 : vector<8xf32> to vector<8x1xf32>
    %246 = vector.broadcast %245 : vector<8x1xf32> to vector<8x8xf32>
    %247 = arith.subf %243, %246 : vector<8x8xf32>
    %248 = math.exp %247 : vector<8x8xf32>
    %cst_102 = arith.constant dense<0.000000e+00> : vector<8xf32>
    %249 = vector.multi_reduction <add>, %248, %cst_102 [1] : vector<8x8xf32> to vector<8xf32>
    %250 = vector.shape_cast %249 : vector<8xf32> to vector<8x1xf32>
    %251 = tpu.reciprocal %250 {approx = true} : vector<8x1xf32> -> vector<8x1xf32>
    %252 = vector.broadcast %251 : vector<8x1xf32> to vector<8x8xf32>
    %253 = arith.mulf %248, %252 : vector<8x8xf32>
    %254 = arith.truncf %253 : vector<8x8xf32> to vector<8x8xbf16>
    %255 = arith.truncf %240 : vector<8x16xf32> to vector<8x16xbf16>
    %cst_103 = arith.constant dense<0.000000e+00> : vector<8x16xf32>
    %256 = tpu.matmul %254, %255, %cst_103 {dimension_numbers = #tpu.dot_dimension_numbers<[1], [0], [0], [1], [0, 0, 1, 1], [], []>} : vector<8x8xbf16>, vector<8x16xbf16>, vector<8x16xf32> -> vector<8x16xf32>
    %257 = vector.extract_strided_slice %214 {offsets = [0, 32], sizes = [8, 16], strides = [1, 1]} : vector<8x192xf32> to vector<8x16xf32>
    %cst_104 = arith.constant 2.500000e-01 : f32
    %258 = vector.broadcast %cst_104 : f32 to vector<8x16xf32>
    %259 = arith.mulf %257, %258 : vector<8x16xf32>
    %260 = vector.extract_strided_slice %214 {offsets = [0, 96], sizes = [8, 16], strides = [1, 1]} : vector<8x192xf32> to vector<8x16xf32>
    %261 = vector.extract_strided_slice %214 {offsets = [0, 160], sizes = [8, 16], strides = [1, 1]} : vector<8x192xf32> to vector<8x16xf32>
    %262 = arith.truncf %259 : vector<8x16xf32> to vector<8x16xbf16>
    %263 = arith.truncf %260 : vector<8x16xf32> to vector<8x16xbf16>
    %cst_105 = arith.constant dense<0.000000e+00> : vector<8x8xf32>
    %264 = tpu.matmul %262, %263, %cst_105 {dimension_numbers = #tpu.dot_dimension_numbers<[1], [1], [0], [0], [0, 0, 1, 0], [], []>} : vector<8x16xbf16>, vector<8x16xbf16>, vector<8x8xf32> -> vector<8x8xf32>
    %cst_106 = arith.constant dense<0xFF800000> : vector<8xf32>
    %265 = vector.multi_reduction <maximumf>, %264, %cst_106 [1] : vector<8x8xf32> to vector<8xf32>
    %266 = vector.shape_cast %265 : vector<8xf32> to vector<8x1xf32>
    %267 = vector.broadcast %266 : vector<8x1xf32> to vector<8x8xf32>
    %268 = arith.subf %264, %267 : vector<8x8xf32>
    %269 = math.exp %268 : vector<8x8xf32>
    %cst_107 = arith.constant dense<0.000000e+00> : vector<8xf32>
    %270 = vector.multi_reduction <add>, %269, %cst_107 [1] : vector<8x8xf32> to vector<8xf32>
    %271 = vector.shape_cast %270 : vector<8xf32> to vector<8x1xf32>
    %272 = tpu.reciprocal %271 {approx = true} : vector<8x1xf32> -> vector<8x1xf32>
    %273 = vector.broadcast %272 : vector<8x1xf32> to vector<8x8xf32>
    %274 = arith.mulf %269, %273 : vector<8x8xf32>
    %275 = arith.truncf %274 : vector<8x8xf32> to vector<8x8xbf16>
    %276 = arith.truncf %261 : vector<8x16xf32> to vector<8x16xbf16>
    %cst_108 = arith.constant dense<0.000000e+00> : vector<8x16xf32>
    %277 = tpu.matmul %275, %276, %cst_108 {dimension_numbers = #tpu.dot_dimension_numbers<[1], [0], [0], [1], [0, 0, 1, 1], [], []>} : vector<8x8xbf16>, vector<8x16xbf16>, vector<8x16xf32> -> vector<8x16xf32>
    %278 = vector.extract_strided_slice %214 {offsets = [0, 48], sizes = [8, 16], strides = [1, 1]} : vector<8x192xf32> to vector<8x16xf32>
    %cst_109 = arith.constant 2.500000e-01 : f32
    %279 = vector.broadcast %cst_109 : f32 to vector<8x16xf32>
    %280 = arith.mulf %278, %279 : vector<8x16xf32>
    %281 = vector.extract_strided_slice %214 {offsets = [0, 112], sizes = [8, 16], strides = [1, 1]} : vector<8x192xf32> to vector<8x16xf32>
    %282 = vector.extract_strided_slice %214 {offsets = [0, 176], sizes = [8, 16], strides = [1, 1]} : vector<8x192xf32> to vector<8x16xf32>
    %283 = arith.truncf %280 : vector<8x16xf32> to vector<8x16xbf16>
    %284 = arith.truncf %281 : vector<8x16xf32> to vector<8x16xbf16>
    %cst_110 = arith.constant dense<0.000000e+00> : vector<8x8xf32>
    %285 = tpu.matmul %283, %284, %cst_110 {dimension_numbers = #tpu.dot_dimension_numbers<[1], [1], [0], [0], [0, 0, 1, 0], [], []>} : vector<8x16xbf16>, vector<8x16xbf16>, vector<8x8xf32> -> vector<8x8xf32>
    %cst_111 = arith.constant dense<0xFF800000> : vector<8xf32>
    %286 = vector.multi_reduction <maximumf>, %285, %cst_111 [1] : vector<8x8xf32> to vector<8xf32>
    %287 = vector.shape_cast %286 : vector<8xf32> to vector<8x1xf32>
    %288 = vector.broadcast %287 : vector<8x1xf32> to vector<8x8xf32>
    %289 = arith.subf %285, %288 : vector<8x8xf32>
    %290 = math.exp %289 : vector<8x8xf32>
    %cst_112 = arith.constant dense<0.000000e+00> : vector<8xf32>
    %291 = vector.multi_reduction <add>, %290, %cst_112 [1] : vector<8x8xf32> to vector<8xf32>
    %292 = vector.shape_cast %291 : vector<8xf32> to vector<8x1xf32>
    %293 = tpu.reciprocal %292 {approx = true} : vector<8x1xf32> -> vector<8x1xf32>
    %294 = vector.broadcast %293 : vector<8x1xf32> to vector<8x8xf32>
    %295 = arith.mulf %290, %294 : vector<8x8xf32>
    %296 = arith.truncf %295 : vector<8x8xf32> to vector<8x8xbf16>
    %297 = arith.truncf %282 : vector<8x16xf32> to vector<8x16xbf16>
    %cst_113 = arith.constant dense<0.000000e+00> : vector<8x16xf32>
    %298 = tpu.matmul %296, %297, %cst_113 {dimension_numbers = #tpu.dot_dimension_numbers<[1], [0], [0], [1], [0, 0, 1, 1], [], []>} : vector<8x8xbf16>, vector<8x16xbf16>, vector<8x16xf32> -> vector<8x16xf32>
    %299 = tpu.concatenate %235, %256, %277, %298 in 1 : vector<8x16xf32>, vector<8x16xf32>, vector<8x16xf32>, vector<8x16xf32> -> vector<8x64xf32>
    %300 = arith.truncf %299 : vector<8x64xf32> to vector<8x64xbf16>
    %c1_114 = arith.constant 1 : index
    %c0_115 = arith.constant 0 : index
    %c0_116 = arith.constant 0 : index
    %301 = vector.load %arg9[%c1_114, %c0_115, %c0_116] : memref<2x64x32xbf16, #tpu.memory_space<vmem>>, vector<1x64x32xbf16>
    %302 = vector.shape_cast %301 : vector<1x64x32xbf16> to vector<64x32xbf16>
    %cst_117 = arith.constant dense<0.000000e+00> : vector<8x32xf32>
    %303 = tpu.matmul %300, %302, %cst_117 {dimension_numbers = #tpu.dot_dimension_numbers<[1], [0], [0], [1], [0, 0, 1, 1], [], []>} : vector<8x64xbf16>, vector<64x32xbf16>, vector<8x32xf32> -> vector<8x32xf32>
    %c1_118 = arith.constant 1 : index
    %c0_119 = arith.constant 0 : index
    %c0_120 = arith.constant 0 : index
    %304 = vector.load %arg10[%c1_118, %c0_119, %c0_120] : memref<2x1x32xf32, #tpu.memory_space<vmem>>, vector<1x1x32xf32>
    %305 = vector.shape_cast %304 : vector<1x1x32xf32> to vector<1x32xf32>
    %306 = vector.broadcast %305 : vector<1x32xf32> to vector<8x32xf32>
    %307 = arith.addf %303, %306 : vector<8x32xf32>
    %308 = arith.addf %186, %307 : vector<8x32xf32>
    %c1_121 = arith.constant 1 : index
    %c0_122 = arith.constant 0 : index
    %c0_123 = arith.constant 0 : index
    %309 = vector.load %arg11[%c1_121, %c0_122, %c0_123] : memref<2x1x32xf32, #tpu.memory_space<vmem>>, vector<1x1x32xf32>
    %310 = vector.shape_cast %309 : vector<1x1x32xf32> to vector<1x32xf32>
    %c1_124 = arith.constant 1 : index
    %c0_125 = arith.constant 0 : index
    %c0_126 = arith.constant 0 : index
    %311 = vector.load %arg12[%c1_124, %c0_125, %c0_126] : memref<2x1x32xf32, #tpu.memory_space<vmem>>, vector<1x1x32xf32>
    %312 = vector.shape_cast %311 : vector<1x1x32xf32> to vector<1x32xf32>
    %cst_127 = arith.constant dense<0.000000e+00> : vector<8xf32>
    %313 = vector.multi_reduction <add>, %308, %cst_127 [1] : vector<8x32xf32> to vector<8xf32>
    %314 = vector.shape_cast %313 : vector<8xf32> to vector<8x1xf32>
    %cst_128 = arith.constant 3.200000e+01 : f32
    %315 = vector.broadcast %cst_128 : f32 to vector<8x1xf32>
    %316 = arith.divf %314, %315 : vector<8x1xf32>
    %317 = vector.broadcast %316 : vector<8x1xf32> to vector<8x32xf32>
    %318 = arith.subf %308, %317 : vector<8x32xf32>
    %319 = arith.mulf %318, %318 : vector<8x32xf32>
    %cst_129 = arith.constant dense<0.000000e+00> : vector<8xf32>
    %320 = vector.multi_reduction <add>, %319, %cst_129 [1] : vector<8x32xf32> to vector<8xf32>
    %321 = vector.shape_cast %320 : vector<8xf32> to vector<8x1xf32>
    %cst_130 = arith.constant 3.200000e+01 : f32
    %322 = vector.broadcast %cst_130 : f32 to vector<8x1xf32>
    %323 = arith.divf %321, %322 : vector<8x1xf32>
    %cst_131 = arith.constant 9.99999974E-6 : f32
    %324 = vector.broadcast %cst_131 : f32 to vector<8x1xf32>
    %325 = arith.addf %323, %324 : vector<8x1xf32>
    %326 = math.rsqrt %325 : vector<8x1xf32>
    %327 = vector.broadcast %326 : vector<8x1xf32> to vector<8x32xf32>
    %328 = arith.mulf %318, %327 : vector<8x32xf32>
    %329 = vector.broadcast %310 : vector<1x32xf32> to vector<8x32xf32>
    %330 = arith.mulf %328, %329 : vector<8x32xf32>
    %331 = vector.broadcast %312 : vector<1x32xf32> to vector<8x32xf32>
    %332 = arith.addf %330, %331 : vector<8x32xf32>
    %333 = arith.truncf %332 : vector<8x32xf32> to vector<8x32xbf16>
    %c1_132 = arith.constant 1 : index
    %c0_133 = arith.constant 0 : index
    %c0_134 = arith.constant 0 : index
    %334 = vector.load %arg13[%c1_132, %c0_133, %c0_134] : memref<2x32x64xbf16, #tpu.memory_space<vmem>>, vector<1x32x64xbf16>
    %335 = vector.shape_cast %334 : vector<1x32x64xbf16> to vector<32x64xbf16>
    %cst_135 = arith.constant dense<0.000000e+00> : vector<8x64xf32>
    %336 = tpu.matmul %333, %335, %cst_135 {dimension_numbers = #tpu.dot_dimension_numbers<[1], [0], [0], [1], [0, 0, 1, 1], [], []>} : vector<8x32xbf16>, vector<32x64xbf16>, vector<8x64xf32> -> vector<8x64xf32>
    %c1_136 = arith.constant 1 : index
    %c0_137 = arith.constant 0 : index
    %c0_138 = arith.constant 0 : index
    %337 = vector.load %arg14[%c1_136, %c0_137, %c0_138] : memref<2x1x64xf32, #tpu.memory_space<vmem>>, vector<1x1x64xf32>
    %338 = vector.shape_cast %337 : vector<1x1x64xf32> to vector<1x64xf32>
    %339 = vector.broadcast %338 : vector<1x64xf32> to vector<8x64xf32>
    %340 = arith.addf %336, %339 : vector<8x64xf32>
    %cst_139 = arith.constant 5.000000e-01 : f32
    %341 = vector.broadcast %cst_139 : f32 to vector<8x64xf32>
    %342 = arith.mulf %341, %340 : vector<8x64xf32>
    %cst_140 = arith.constant 4.471500e-02 : f32
    %343 = vector.broadcast %cst_140 : f32 to vector<8x64xf32>
    %344 = arith.mulf %343, %340 : vector<8x64xf32>
    %345 = arith.mulf %344, %340 : vector<8x64xf32>
    %346 = arith.mulf %345, %340 : vector<8x64xf32>
    %347 = arith.addf %340, %346 : vector<8x64xf32>
    %cst_141 = arith.constant 0.797884583 : f32
    %348 = vector.broadcast %cst_141 : f32 to vector<8x64xf32>
    %349 = arith.mulf %348, %347 : vector<8x64xf32>
    %350 = math.tanh %349 : vector<8x64xf32>
    %cst_142 = arith.constant 1.000000e+00 : f32
    %351 = vector.broadcast %cst_142 : f32 to vector<8x64xf32>
    %352 = arith.addf %351, %350 : vector<8x64xf32>
    %353 = arith.mulf %342, %352 : vector<8x64xf32>
    %354 = arith.truncf %353 : vector<8x64xf32> to vector<8x64xbf16>
    %c1_143 = arith.constant 1 : index
    %c0_144 = arith.constant 0 : index
    %c0_145 = arith.constant 0 : index
    %355 = vector.load %arg15[%c1_143, %c0_144, %c0_145] : memref<2x64x32xbf16, #tpu.memory_space<vmem>>, vector<1x64x32xbf16>
    %356 = vector.shape_cast %355 : vector<1x64x32xbf16> to vector<64x32xbf16>
    %cst_146 = arith.constant dense<0.000000e+00> : vector<8x32xf32>
    %357 = tpu.matmul %354, %356, %cst_146 {dimension_numbers = #tpu.dot_dimension_numbers<[1], [0], [0], [1], [0, 0, 1, 1], [], []>} : vector<8x64xbf16>, vector<64x32xbf16>, vector<8x32xf32> -> vector<8x32xf32>
    %c1_147 = arith.constant 1 : index
    %c0_148 = arith.constant 0 : index
    %c0_149 = arith.constant 0 : index
    %358 = vector.load %arg16[%c1_147, %c0_148, %c0_149] : memref<2x1x32xf32, #tpu.memory_space<vmem>>, vector<1x1x32xf32>
    %359 = vector.shape_cast %358 : vector<1x1x32xf32> to vector<1x32xf32>
    %360 = vector.broadcast %359 : vector<1x32xf32> to vector<8x32xf32>
    %361 = arith.addf %357, %360 : vector<8x32xf32>
    %362 = arith.addf %308, %361 : vector<8x32xf32>
    %363 = arith.index_cast %arg0 : i32 to index
    %364 = memref.load %arg1[%363] : memref<2xi32, #tpu.memory_space<smem>>
    %365 = tpu.iota {dimensions = array<i32: 1>} : vector<1x8xi32>
    %366 = vector.broadcast %364 : i32 to vector<1x8xi32>
    %367 = arith.cmpi eq, %365, %366 : vector<1x8xi32>
    %368 = arith.extui %367 : vector<1x8xi1> to vector<1x8xi32>
    %369 = arith.sitofp %368 : vector<1x8xi32> to vector<1x8xf32>
    %cst_150 = arith.constant dense<0.000000e+00> : vector<1x32xf32>
    %370 = tpu.matmul %369, %362, %cst_150 {dimension_numbers = #tpu.dot_dimension_numbers<[1], [0], [0], [1], [0, 0, 1, 1], [], []>} : vector<1x8xf32>, vector<8x32xf32>, vector<1x32xf32> -> vector<1x32xf32>
    %c0_151 = arith.constant 0 : index
    %c0_152 = arith.constant 0 : index
    %371 = vector.load %arg17[%c0_151, %c0_152] : memref<1x32xf32, #tpu.memory_space<vmem>>, vector<1x32xf32>
    %c0_153 = arith.constant 0 : index
    %c0_154 = arith.constant 0 : index
    %372 = vector.load %arg18[%c0_153, %c0_154] : memref<1x32xf32, #tpu.memory_space<vmem>>, vector<1x32xf32>
    %cst_155 = arith.constant dense<0.000000e+00> : vector<1xf32>
    %373 = vector.multi_reduction <add>, %370, %cst_155 [1] : vector<1x32xf32> to vector<1xf32>
    %374 = vector.shape_cast %373 : vector<1xf32> to vector<1x1xf32>
    %cst_156 = arith.constant 3.200000e+01 : f32
    %375 = vector.broadcast %cst_156 : f32 to vector<1x1xf32>
    %376 = arith.divf %374, %375 : vector<1x1xf32>
    %377 = vector.broadcast %376 : vector<1x1xf32> to vector<1x32xf32>
    %378 = arith.subf %370, %377 : vector<1x32xf32>
    %379 = arith.mulf %378, %378 : vector<1x32xf32>
    %cst_157 = arith.constant dense<0.000000e+00> : vector<1xf32>
    %380 = vector.multi_reduction <add>, %379, %cst_157 [1] : vector<1x32xf32> to vector<1xf32>
    %381 = vector.shape_cast %380 : vector<1xf32> to vector<1x1xf32>
    %cst_158 = arith.constant 3.200000e+01 : f32
    %382 = vector.broadcast %cst_158 : f32 to vector<1x1xf32>
    %383 = arith.divf %381, %382 : vector<1x1xf32>
    %cst_159 = arith.constant 9.99999974E-6 : f32
    %384 = vector.broadcast %cst_159 : f32 to vector<1x1xf32>
    %385 = arith.addf %383, %384 : vector<1x1xf32>
    %386 = math.rsqrt %385 : vector<1x1xf32>
    %387 = vector.broadcast %386 : vector<1x1xf32> to vector<1x32xf32>
    %388 = arith.mulf %378, %387 : vector<1x32xf32>
    %389 = arith.mulf %388, %371 : vector<1x32xf32>
    %390 = arith.addf %389, %372 : vector<1x32xf32>
    %c0_160 = arith.constant 0 : index
    %c0_161 = arith.constant 0 : index
    %391 = vector.load %arg19[%c0_160, %c0_161] : memref<32x5xf32, #tpu.memory_space<vmem>>, vector<32x5xf32>
    %cst_162 = arith.constant dense<0.000000e+00> : vector<1x5xf32>
    %392 = tpu.matmul %390, %391, %cst_162 {dimension_numbers = #tpu.dot_dimension_numbers<[1], [0], [0], [1], [0, 0, 1, 1], [], []>} : vector<1x32xf32>, vector<32x5xf32>, vector<1x5xf32> -> vector<1x5xf32>
    %c0_163 = arith.constant 0 : index
    %c0_164 = arith.constant 0 : index
    %393 = vector.load %arg20[%c0_163, %c0_164] : memref<1x5xf32, #tpu.memory_space<vmem>>, vector<1x5xf32>
    %394 = arith.addf %392, %393 : vector<1x5xf32>
    %c0_165 = arith.constant 0 : index
    %c0_166 = arith.constant 0 : index
    %c0_167 = arith.constant 0 : index
    %395 = vector.load %arg21[%c0_165, %c0_166, %c0_167] : memref<1x1x5xf32, #tpu.memory_space<vmem>>, vector<1x1x5xf32>
    %396 = vector.shape_cast %395 : vector<1x1x5xf32> to vector<1x5xf32>
    %397 = vector.shape_cast %394 : vector<1x5xf32> to vector<1x1x5xf32>
    tpu.vector_store %arg21[%c0_165, %c0_166, %c0_167], %397 {strides = array<i32>} : memref<1x1x5xf32, #tpu.memory_space<vmem>>, vector<1x1x5xf32>,
    return
  }
  func.func @transform_0(%arg0: i32, %arg1: memref<2xi32, #tpu.memory_space<smem>>) -> (i32, i32, i32) {
    %c0_i32 = arith.constant 0 : i32
    %c0_i32_0 = arith.constant 0 : i32
    %c0_i32_1 = arith.constant 0 : i32
    return %arg0, %c0_i32, %c0_i32_0 : i32, i32, i32
  }
  func.func @transform_1(%arg0: i32, %arg1: memref<2xi32, #tpu.memory_space<smem>>) -> (i32, i32, i32) {
    %c0_i32 = arith.constant 0 : i32
    %c0_i32_0 = arith.constant 0 : i32
    %c0_i32_1 = arith.constant 0 : i32
    %c0_i32_2 = arith.constant 0 : i32
    return %c0_i32, %c0_i32_0, %c0_i32_1 : i32, i32, i32
  }
  func.func @transform_2(%arg0: i32, %arg1: memref<2xi32, #tpu.memory_space<smem>>) -> (i32, i32) {
    %c0_i32 = arith.constant 0 : i32
    %c0_i32_0 = arith.constant 0 : i32
    %c0_i32_1 = arith.constant 0 : i32
    return %c0_i32, %c0_i32_0 : i32, i32
  }
  func.func @transform_3(%arg0: i32, %arg1: memref<2xi32, #tpu.memory_space<smem>>) -> (i32, i32) {
    %c0_i32 = arith.constant 0 : i32
    %c0_i32_0 = arith.constant 0 : i32
    %c0_i32_1 = arith.constant 0 : i32
    return %c0_i32, %c0_i32_0 : i32, i32
  }
  func.func @transform_4(%arg0: i32, %arg1: memref<2xi32, #tpu.memory_space<smem>>) -> (i32, i32, i32) {
    %c0_i32 = arith.constant 0 : i32
    %c0_i32_0 = arith.constant 0 : i32
    %c0_i32_1 = arith.constant 0 : i32
    %c0_i32_2 = arith.constant 0 : i32
    return %c0_i32, %c0_i32_0, %c0_i32_1 : i32, i32, i32
  }
  func.func @transform_5(%arg0: i32, %arg1: memref<2xi32, #tpu.memory_space<smem>>) -> (i32, i32, i32) {
    %c0_i32 = arith.constant 0 : i32
    %c0_i32_0 = arith.constant 0 : i32
    %c0_i32_1 = arith.constant 0 : i32
    %c0_i32_2 = arith.constant 0 : i32
    return %c0_i32, %c0_i32_0, %c0_i32_1 : i32, i32, i32
  }
  func.func @transform_6(%arg0: i32, %arg1: memref<2xi32, #tpu.memory_space<smem>>) -> (i32, i32, i32) {
    %c0_i32 = arith.constant 0 : i32
    %c0_i32_0 = arith.constant 0 : i32
    %c0_i32_1 = arith.constant 0 : i32
    %c0_i32_2 = arith.constant 0 : i32
    return %c0_i32, %c0_i32_0, %c0_i32_1 : i32, i32, i32
  }
  func.func @transform_7(%arg0: i32, %arg1: memref<2xi32, #tpu.memory_space<smem>>) -> (i32, i32, i32) {
    %c0_i32 = arith.constant 0 : i32
    %c0_i32_0 = arith.constant 0 : i32
    %c0_i32_1 = arith.constant 0 : i32
    %c0_i32_2 = arith.constant 0 : i32
    return %c0_i32, %c0_i32_0, %c0_i32_1 : i32, i32, i32
  }
  func.func @transform_8(%arg0: i32, %arg1: memref<2xi32, #tpu.memory_space<smem>>) -> (i32, i32, i32) {
    %c0_i32 = arith.constant 0 : i32
    %c0_i32_0 = arith.constant 0 : i32
    %c0_i32_1 = arith.constant 0 : i32
    %c0_i32_2 = arith.constant 0 : i32
    return %c0_i32, %c0_i32_0, %c0_i32_1 : i32, i32, i32
  }
  func.func @transform_9(%arg0: i32, %arg1: memref<2xi32, #tpu.memory_space<smem>>) -> (i32, i32, i32) {
    %c0_i32 = arith.constant 0 : i32
    %c0_i32_0 = arith.constant 0 : i32
    %c0_i32_1 = arith.constant 0 : i32
    %c0_i32_2 = arith.constant 0 : i32
    return %c0_i32, %c0_i32_0, %c0_i32_1 : i32, i32, i32
  }
  func.func @transform_10(%arg0: i32, %arg1: memref<2xi32, #tpu.memory_space<smem>>) -> (i32, i32, i32) {
    %c0_i32 = arith.constant 0 : i32
    %c0_i32_0 = arith.constant 0 : i32
    %c0_i32_1 = arith.constant 0 : i32
    %c0_i32_2 = arith.constant 0 : i32
    return %c0_i32, %c0_i32_0, %c0_i32_1 : i32, i32, i32
  }
  func.func @transform_11(%arg0: i32, %arg1: memref<2xi32, #tpu.memory_space<smem>>) -> (i32, i32, i32) {
    %c0_i32 = arith.constant 0 : i32
    %c0_i32_0 = arith.constant 0 : i32
    %c0_i32_1 = arith.constant 0 : i32
    %c0_i32_2 = arith.constant 0 : i32
    return %c0_i32, %c0_i32_0, %c0_i32_1 : i32, i32, i32
  }
  func.func @transform_12(%arg0: i32, %arg1: memref<2xi32, #tpu.memory_space<smem>>) -> (i32, i32, i32) {
    %c0_i32 = arith.constant 0 : i32
    %c0_i32_0 = arith.constant 0 : i32
    %c0_i32_1 = arith.constant 0 : i32
    %c0_i32_2 = arith.constant 0 : i32
    return %c0_i32, %c0_i32_0, %c0_i32_1 : i32, i32, i32
  }
  func.func @transform_13(%arg0: i32, %arg1: memref<2xi32, #tpu.memory_space<smem>>) -> (i32, i32, i32) {
    %c0_i32 = arith.constant 0 : i32
    %c0_i32_0 = arith.constant 0 : i32
    %c0_i32_1 = arith.constant 0 : i32
    %c0_i32_2 = arith.constant 0 : i32
    return %c0_i32, %c0_i32_0, %c0_i32_1 : i32, i32, i32
  }
  func.func @transform_14(%arg0: i32, %arg1: memref<2xi32, #tpu.memory_space<smem>>) -> (i32, i32, i32) {
    %c0_i32 = arith.constant 0 : i32
    %c0_i32_0 = arith.constant 0 : i32
    %c0_i32_1 = arith.constant 0 : i32
    %c0_i32_2 = arith.constant 0 : i32
    return %c0_i32, %c0_i32_0, %c0_i32_1 : i32, i32, i32
  }
  func.func @transform_15(%arg0: i32, %arg1: memref<2xi32, #tpu.memory_space<smem>>) -> (i32, i32) {
    %c0_i32 = arith.constant 0 : i32
    %c0_i32_0 = arith.constant 0 : i32
    %c0_i32_1 = arith.constant 0 : i32
    return %c0_i32, %c0_i32_0 : i32, i32
  }
  func.func @transform_16(%arg0: i32, %arg1: memref<2xi32, #tpu.memory_space<smem>>) -> (i32, i32) {
    %c0_i32 = arith.constant 0 : i32
    %c0_i32_0 = arith.constant 0 : i32
    %c0_i32_1 = arith.constant 0 : i32
    return %c0_i32, %c0_i32_0 : i32, i32
  }
  func.func @transform_17(%arg0: i32, %arg1: memref<2xi32, #tpu.memory_space<smem>>) -> (i32, i32) {
    %c0_i32 = arith.constant 0 : i32
    %c0_i32_0 = arith.constant 0 : i32
    %c0_i32_1 = arith.constant 0 : i32
    return %c0_i32, %c0_i32_0 : i32, i32
  }
  func.func @transform_18(%arg0: i32, %arg1: memref<2xi32, #tpu.memory_space<smem>>) -> (i32, i32) {
    %c0_i32 = arith.constant 0 : i32
    %c0_i32_0 = arith.constant 0 : i32
    %c0_i32_1 = arith.constant 0 : i32
    return %c0_i32, %c0_i32_0 : i32, i32
  }
  func.func @transform_19(%arg0: i32, %arg1: memref<2xi32, #tpu.memory_space<smem>>) -> (i32, i32, i32) {
    %c0_i32 = arith.constant 0 : i32
    %c0_i32_0 = arith.constant 0 : i32
    %c0_i32_1 = arith.constant 0 : i32
    return %arg0, %c0_i32, %c0_i32_0 : i32, i32, i32
  }
}

</mosaic_0001>

<bundles_post_ra>
// kernel: vit_forward.1
= control target key start
LH: loop header
LB: loop body
LE: loop exit
PB: predicated region body
PF: predicated region fallthrough
CT: control target
= control target key end

     0   :  { %s3750_s0 = inlined_call_operand.vmem [shape: s32[2], index: 0, kind: input, shape index: {}]   ;;  %s3751_s1 = inlined_call_operand.vmem [shape: f32[2,8,16], index: 1, kind: input, shape index: {}]   ;;  %s3752_s2 = inlined_call_operand.vmem [shape: f32[1,8,32], index: 2, kind: input, shape index: {}]   ;;  %s3753_s3 = inlined_call_operand.vmem [shape: bf16[16,32], index: 3, kind: input, shape index: {}]   ;;  %s3754_s4 = inlined_call_operand.vmem [shape: f32[1,32], index: 4, kind: input, shape index: {}]   ;;  %s3755_s5 = inlined_call_operand.vmem [shape: f32[2,1,32], index: 5, kind: input, shape index: {}]   ;;  %s3756_s6 = inlined_call_operand.vmem [shape: f32[2,1,32], index: 6, kind: input, shape index: {}]   ;;  %s3757_s7 = inlined_call_operand.vmem [shape: bf16[2,32,192], index: 7, kind: input, shape index: {}]   ;;  %s3758_s8 = inlined_call_operand.vmem [shape: bf16[2,64,32], index: 8, kind: input, shape index: {}]   ;;  %s3759_s9 = inlined_call_operand.vmem [shape: f32[2,1,32], index: 9, kind: input, shape index: {}]   ;;  %s3760_s10 = inlined_call_operand.vmem [shape: f32[2,1,32], index: 10, kind: input, shape index: {}]   ;;  %s3761_s11 = inlined_call_operand.vmem [shape: f32[2,1,32], index: 11, kind: input, shape index: {}]   ;;  %s3762_s12 = inlined_call_operand.vmem [shape: bf16[2,32,64], index: 12, kind: input, shape index: {}]   ;;  %s3763_s13 = inlined_call_operand.vmem [shape: f32[2,1,64], index: 13, kind: input, shape index: {}]   ;;  %s3764_s14 = inlined_call_operand.vmem [shape: bf16[2,64,32], index: 14, kind: input, shape index: {}]   ;;  %s3765_s15 = inlined_call_operand.vmem [shape: f32[2,1,32], index: 15, kind: input, shape index: {}]   ;;  %s3766_s16 = inlined_call_operand.vmem [shape: f32[1,32], index: 16, kind: input, shape index: {}]   ;;  %s3767_s17 = inlined_call_operand.vmem [shape: f32[1,32], index: 17, kind: input, shape index: {}]   ;;  %s3768_s18 = inlined_call_operand.vmem [shape: f32[32,5], index: 18, kind: input, shape index: {}]   ;;  %s3769_s19 = inlined_call_operand.vmem [shape: f32[1,5], index: 19, kind: input, shape index: {}]   ;;  %s3770_s20 = inlined_call_operand.hbm [shape: f32[2,1,5], index: 20, kind: output, shape index: {}]  }
   0x1   :  { %3787 = sst [smem:[#allocation12_spill]] %s3750_s0 }
   0x2   :  { %3788 = sst [smem:[#allocation13_spill]] %s3751_s1 }
   0x3   :  { %3789 = sst [smem:[#allocation14_spill]] %s3752_s2 }
   0x4   :  { %3790 = sst [smem:[#allocation15_spill]] %s3753_s3 }
   0x5   :  { %3791 = sst [smem:[#allocation16_spill]] %s3754_s4 }
   0x6   :  { %3792 = sst [smem:[#allocation17_spill]] %s3763_s13 }
   0x7   :  { %s3793_s23 = sld [smem:[#allocation12_spill]] }
   0xd   :  { %s25_s13 = sshll.u32 %s3793_s23, 4  ;;  %s26_s13 = int_to_ptr.vmem [resolvable:$true] %s25_s13 }
   0xe   :  { %s3078_s24 = scalar_lea.vmem %s26_s13, 16  ;;  %p3083_p1 = scmp.lt.s32.totalorder %s26_s13, %s26_s13 }
   0xf   :  { %p3079_p0 = scmp.ne.s32.totalorder %s26_s13, %s3078_s24  ;;  %p3084_p2 = scmp.lt.s32.totalorder %s3078_s24, %s3078_s24 }
  0x11   :  { %p3085_p3 = por %p3084_p2, %p3083_p1 }
  0x13   :  { %p3086_p4 = pnand %p3085_p3, %p3079_p0 }
  0x15   :  { %3089 = shalt.err (!%p3086_p4)  }
  0x16   :  { %s3154_s2 = smov [#allocation3]  }
  0x17   :  { %28 = dma.vmem_to_smem %s26_s13, 16, %s3154_s2, [#allocation2] }
  0x18   :  { %3132 = dma.done.wait [#allocation2], 16 }
  0x19   :  { %3133 = vsyncadd [#allocation2], 4294967280 }
  0x1a   :  { %30 = sfence }
  0x1b   :  { %31 = vsyncpa [#allocation5], 0 }
  0x1c   :  { %33 = vsyncpa [#allocation5 + $0x1], 0  ;;  %s3274_s25 = smov 0   ;;  %s3276_s3 = smov 0  }
  0x1d   :  { %s3278_s26 = smov 0   ;;  %s3280_s27 = smov 0  }
  0x1e LB: > { %3794 = sst [smem:[#allocation8_spill]] %s3148_s26  ;;  %s3295_s13 = sadd.s32 4294967295, %s3152_s27   ;;  %s3152_s27 = sphi %s3280_s27, %s3811_s27   ;;  %s3148_s26 = sphi %s3278_s26, %s3813_s26   ;;  %s3144_s3 = sphi %s3276_s3, %s3815_s3   ;;  %s3140_s25 = sphi %s3274_s25, %s3814_s25  }
  0x1f   : > { %s2589_s28 = sadd.s32 4294967294, %s3152_s27   ;;  %s3299_s4 = sadd.s32 1, %s3152_s27  }
  0x20   : > { %3795 = sst [smem:[#allocation9_spill]] %s3299_s4  ;;  %s450_s29 = sadd.s32 1, %s3148_s26 }
  0x21   : > { %s447_s30 = ssub.s32 %s3152_s27, %s3299_s4  ;;  %p460_p5 = scmp.ne.s32.totalorder %s3148_s26, %s3144_s3 }
  0x22   : > { %p448_p6 = scmp.eq.s32.totalorder %s447_s30, 0  ;;  %p461_p7 = scmp.eq.s32.totalorder %s3295_s13, 1 }
  0x23   : > { %p466_p8 = scmp.ne.s32.totalorder %s3144_s3, %s3140_s25  ;;  %p467_p9 = scmp.eq.s32.totalorder %s2589_s28, 1 }
  0x24   : > { %s3310_s0 = scalar_select %p448_p6, %s3148_s26, %s450_s29  }
  0x25   : > { %p3312_p10 = por %p461_p7, %p460_p5  ;;  %p3316_p11 = por %p467_p9, %p466_p8 }
  0x26   : > { %3796 = sst [smem:[#allocation10_spill]] %s3310_s0  ;;  %p2592_p12 = scmp.ge.s32.totalorder %s3152_s27, 1 }
  0x27   : > { %s3798_s1 = scalar_select %p3316_p11, 1, 0 }
  0x28   : > { %p546_p13 = scmp.lt.s32.totalorder %s3152_s27, 3 }
  0x29   : > { %3799 = sst [smem:[#allocation11_spill]] %s3798_s1 }
  0x2a   : > { %p547_p0 = pnand %p2592_p12, %p546_p13 }
  0x2b   : > { %s3800_s24 = sld [smem:[#allocation15_spill]] (!%p547_p0)  ;;  %p600_p1 = scmp.lt.s32.totalorder (!%p547_p0), %s3295_s13, 1 }
  0x2c   : > { %550 = sbr.rel (%p547_p0) target bundleno = 5835 (0x16cb), region = 96  ;;  %s3801_s0 = sld [smem:[#allocation13_spill]] (!%p547_p0) }
  0x2d   : > { %s3802_s26 = sld [smem:[#allocation16_spill]] (!%p547_p0)  ;;  %s3158_s4 = smov (!%p547_p0), 64  }
  0x2e   : > { %s3160_s1 = smov (!%p547_p0), 48   ;;  %s3784_s29 = smov (!%p547_p0), 96  }
  0x2f   : > { %s3780_s30 = smov (!%p547_p0), 16   ;;  %s598_s23 = sand.u32 (!%p547_p0), 1, %s3144_s3  }
  0x31   : > { %v2999_v0 = vld [vmem:[%s3800_s24] sm:$0xff]   ;;  %v3155_v1 = vmov 0.0   ;;  %vm3156_vm0 = vmmov 0   ;;  %s601_s2 = scalar_select %p600_p1, %s3295_s13, 1  ;;  %vm622_vm1 = vcmask 130048   ;;  %vm670_vm2 = vcmask 261120  }
  0x32   : > { %2767 = vmatprep.subr.bf16.mxu0 %v3155_v1  ;;  %2769 = vmatprep.mubr.msk.bf16.mxu0 %vm3156_vm0, %v3155_v1  ;;  %v3000_v18 = vld [vmem:[%s3757_s7 + $0x14] ss:$8 sps:$4 sm:$0xff]   ;;  %v3002_v19 = vld [vmem:[%s3757_s7 + $0x10] ss:$8 sps:$4 sm:$0xff]   ;;  %v3003_v20 = vld [vmem:[%s3757_s7 + $0x4] ss:$8 sps:$4 sm:$0xff]  }
  0x33   : > { %2768 = vmatpush3.bf16.msra.mxu0 %v2999_v0  ;;  %s2593_s28 = sshll.u32 %s601_s2, 3  ;;  %v2594_v4 = vld [vmem:[%s3802_s26] ss:$0 sm:$0xff]  ;;  %s3803_s2 = sld [smem:[#allocation14_spill]]  ;;  %739 = vmatprep.subr.bf16.mxu1 %v3000_v18  ;;  %v3157_v21 = vmov 0   ;;  %vm837_vm3 = vcmask 1043456  }
  0x34   : > { %2773 = vmatprep.subr.bf16.mxu0 %v3155_v1  ;;  %s603_s22 = scalar_lea.vmem %s3801_s0, %s2593_s28  ;;  %759 = vmatprep.mubr.bf16.mxu1 %v3157_v21  ;;  %v3005_v22 = vld [vmem:[%s3757_s7] ss:$8 sps:$4 sm:$0xff]   ;;  %s3778_s0 = smov 112   ;;  %vm820_vm4 = vcmask 64512   ;;  %vm1227_vm5 = vcmask 392192   ;;  %vm1269_vm6 = vcmask 523264  }
  0x35   : > { %v605_v2 = vld [vmem:[%s603_s22] sm:$0xff]  ;;  %740 = vmatpush1.bf16.msra.mxu1 %v3002_v19  ;;  %s3782_s28 = smov 32   ;;  %s3776_s22 = smov 80   ;;  %vm2425_vm8 = vcmask 253952   ;;  %vm2519_vm9 = vcmask 32768  }
  0x36   : > { %v606_v3 = vpack.c.bf16 %v605_v2, %v605_v2  ;;  %741 = vmatprep.subr.bf16.mxu1 %v3003_v20  ;;  %v2597_v27 = vld [vmem:[%s3755_s5] ss:$0 sm:$0xff]  ;;  %s3806_s24 = smov 112   ;;  %s2522_s26 = scalar_lea.sflag [#allocation5], %s598_s23 }
  0x37   : > { %v2598_v29 = vld [vmem:[%s3756_s6] ss:$0 sm:$0xff] }
  0x38   : > { %2770 = vmatmul.mubr.msk.bf16.vlgmr.msra.gmra.mxu0 %vm622_vm1, %v606_v3 }
  0x39   : > { %2775 = vmatprep.mubr.msk.bf16.mxu0 %vm3156_vm0, %v3155_v1  ;;  %v666_v6 = vld [vmem:[%s3803_s2] sm:$0xff]  ;;  %742 = vmatpush1.bf16.msra.mxu1 %v3005_v22 }
  0x3a   : > { %2779 = vmatprep.subr.bf16.mxu1 %v3155_v1 }
  0xf8   : > { %v660_v5 = vpop.f32.mrf.mxu0 }
  0xf9   : > { %v661_v7 = vadd.f32 %v2594_v4, %v660_v5 }
  0xfa   : > { %v2771_v8 = vpop.f32.mrf.mxu0 }
  0xfb   : > { %v3343_v9 = vadd.f32 %v666_v6, %v661_v7 }
  0xfc   : > { %v663_v10 = vpop.f32.mrf.mxu0 }
  0xfd   : > { %v671_v11 = vsel %vm670_vm2, %v3343_v9, 0.0 }
  0xfe   : > { %672 = vadd.xlane.f32.xlu0 %v671_v11  ;;  %v2772_v12 = vpop.f32.mrf.mxu0 }
 0x187   : > { %v673_v13 = vpop.xlane.xlu0 %672 }
 0x188   : > { %v675_v14 = vmul.f32 0.03125, %v673_v13 }
 0x18a   : > { %v676_v15 = vsub.f32 %v3343_v9, %v675_v14 }
 0x18c   : > { %v677_v16 = vmul.f32 %v676_v15, %v676_v15 }
 0x18e   : > { %v678_v17 = vsel %vm670_vm2, %v677_v16, 0.0 }
 0x18f   : > { %679 = vadd.xlane.f32.xlu0 %v678_v17 }
 0x218   : > { %v680_v23 = vpop.xlane.xlu0 %679 }
 0x219   : > { %v681_v24 = vmul.f32 0.03125, %v680_v23 }
 0x21b   : > { %v682_v25 = vadd.f32 1e-05, %v681_v24 }
 0x21d   : > { %3032 = vrsqrt.f32 %v682_v25 }
 0x22a   : > { %v3033_v26 = vpop.eup %3032 }
 0x22b   : > { %v684_v28 = vmul.f32 %v3033_v26, %v676_v15 }
 0x22d   : > { %v691_v30 = vmul.f32 %v2597_v27, %v684_v28 }
 0x22f   : > { %v698_v31 = vadd.f32 %v2598_v29, %v691_v30 }
 0x231   : > { %v699_v32 = vpack.c.bf16 %v698_v31, %v698_v31 }
 0x233   : > { %2603 = vmatmul.mubr.msk.bf16.vlgmr.msra.gmra.mxu1 %vm670_vm2, %v699_v32 }
 0x234   : > { %2781 = vmatprep.mubr.msk.bf16.mxu1 %vm3156_vm0, %v3155_v1 }
 0x2f3   : > { %v761_v33 = vpop.f32.mrf.mxu1 }
 0x2f4   : > { %v768_v34 = vmul.f32 0.25, %v761_v33  ;;  %v770_v35 = vpack.c.bf16 %v761_v33, %v761_v33 }
 0x2f5   : > { %v763_v36 = vpop.f32.mrf.mxu1 }
 0x2f6   : > { %v769_v37 = vpack.c.bf16 %v768_v34, %v768_v34  ;;  %v3372_v38 = vpack.c.bf16 %v763_v36, %v763_v36  ;;  %772 = vrot.lane.b32.xlu1 %v770_v35, %s3158_s4 }
 0x2f7   : > { %v765_v39 = vpop.f32.mrf.mxu1 }
 0x2f8   : > { %882 = vrot.lane.b32.xlu0 %v769_v37, %s3778_s0  ;;  %v839_v40 = vsel %vm837_vm3, %v3372_v38, 0 }
 0x2f9   : > { %v766_v41 = vpop.f32.mrf.mxu1  ;;  %2780 = vmatpush3.bf16.msra.mxu1 %v839_v40 }
 0x2fa   : > { %884 = vrot.lane.b32.xlu1 %v770_v35, %s3160_s1  ;;  %2791 = vmatprep.subr.bf16.mxu1 %v3155_v1 }
 0x2fe   : > { %995 = vrot.lane.b32.xlu1 %v770_v35, %s3782_s28 }
 0x302   : > { %993 = vrot.lane.b32.xlu1 %v769_v37, %s3784_s29 }
 0x306   : > { %1105 = vrot.lane.b32.xlu1 %v770_v35, %s3780_s30 }
 0x30a   : > { %1103 = vrot.lane.b32.xlu1 %v769_v37, %s3776_s22 }
 0x368   : > { %v773_v42 = vpop.permute.xlu1 %772 }
 0x369   : > { %v778_v43 = vsel %vm622_vm1, %v773_v42, 0 }
 0x36a   : > { %2774 = vmatpush3.bf16.xpose.msra.mxu0 %v778_v43  ;;  %v883_v47 = vpop.permute.xlu0 %882 }
 0x36b   : > { %2785 = vmatprep.subr.bf16.mxu0 %v3155_v1 }
 0x36c   : > { %v885_v44 = vpop.permute.xlu1 %884 }
 0x36d   : > { %v890_v45 = vsel %vm622_vm1, %v885_v44, 0 }
 0x370   : > { %v996_v46 = vpop.permute.xlu1 %995 }
 0x371   : > { %2776 = vmatmul.mubr.msk.bf16.vlgmr.msra.gmra.mxu0 %vm622_vm1, %v769_v37  ;;  %v1001_v49 = vsel %vm622_vm1, %v996_v46, 0 }
 0x372   : > { %2786 = vmatpush3.bf16.xpose.msra.mxu0 %v890_v45  ;;  %2787 = vmatprep.mubr.msk.bf16.mxu0 %vm3156_vm0, %v3155_v1 }
 0x373   : > { %2797 = vmatprep.subr.bf16.mxu0 %v3155_v1 }
 0x374   : > { %v994_v48 = vpop.permute.xlu1 %993 }
 0x378   : > { %v1106_v50 = vpop.permute.xlu1 %1105 }
 0x379   : > { %2788 = vmatmul.mubr.msk.bf16.vlgmr.msra.gmra.mxu0 %vm622_vm1, %v883_v47  ;;  %v1111_v51 = vsel %vm622_vm1, %v1106_v50, 0 }
 0x37a   : > { %2798 = vmatpush3.bf16.xpose.msra.mxu0 %v1001_v49  ;;  %2799 = vmatprep.mubr.msk.bf16.mxu0 %vm3156_vm0, %v3155_v1 }
 0x37b   : > { %2809 = vmatprep.subr.bf16.mxu0 %v3155_v1 }
 0x37c   : > { %v1104_v52 = vpop.permute.xlu1 %1103 }
 0x381   : > { %2800 = vmatmul.mubr.msk.bf16.vlgmr.msra.gmra.mxu0 %vm622_vm1, %v994_v48 }
 0x382   : > { %2810 = vmatpush3.bf16.xpose.msra.mxu0 %v1111_v51  ;;  %2811 = vmatprep.mubr.msk.bf16.mxu0 %vm3156_vm0, %v3155_v1 }
 0x383   : > { %2821 = vmatprep.subr.bf16.mxu0 %v3155_v1 }
 0x389   : > { %2812 = vmatmul.mubr.msk.bf16.vlgmr.msra.gmra.mxu0 %vm622_vm1, %v1104_v52 }
 0x38a   : > { %2829 = vmatprep.mubr.msk.bf16.mxu0 %vm3156_vm0, %v3155_v1 }
 0x431   : > { %v814_v53 = vpop.f32.mrf.mxu0 }
 0x432   : > { %v821_v54 = vsel %vm820_vm4, %v814_v53, -inf }
 0x433   : > { %822 = vmax.xlane.f32.xlu1 %v821_v54  ;;  %v2777_v55 = vpop.f32.mrf.mxu0  ;;  %v3006_v54 = vld [vmem:[%s3758_s8 + $0x18] sm:$0xff]  }
 0x434   : > { %2822 = vmatpush3.bf16.msra.mxu0 %v3006_v54 }
 0x435   : > { %v817_v56 = vpop.f32.mrf.mxu0  ;;  %2823 = vmatprep.subr.bf16.mxu0 %v3155_v1 }
 0x437   : > { %v2778_v57 = vpop.f32.mrf.mxu0 }
 0x439   : > { %v926_v58 = vpop.f32.mrf.mxu0 }
 0x43a   : > { %v932_v59 = vsel %vm820_vm4, %v926_v58, -inf }
 0x43b   : > { %933 = vmax.xlane.f32.xlu0 %v932_v59  ;;  %v2789_v60 = vpop.f32.mrf.mxu0 }
 0x43d   : > { %v929_v61 = vpop.f32.mrf.mxu0 }
 0x43f   : > { %v2790_v62 = vpop.f32.mrf.mxu0 }
 0x441   : > { %v1037_v63 = vpop.f32.mrf.mxu0 }
 0x442   : > { %v1043_v0 = vsel %vm820_vm4, %v1037_v63, -inf }
 0x443   : > { %1044 = vmax.xlane.f32.xlu1 %v1043_v0  ;;  %v2801_v2 = vpop.f32.mrf.mxu0  ;;  %v3008_v0 = vld [vmem:[%s3758_s8 + $0x8] sm:$0xff]  }
 0x444   : > { %v3009_v2 = vld [vmem:[%s3758_s8] sm:$0xff]  }
 0x445   : > { %v1040_v3 = vpop.f32.mrf.mxu0 }
 0x447   : > { %v2802_v4 = vpop.f32.mrf.mxu0 }
 0x449   : > { %v1147_v5 = vpop.f32.mrf.mxu0 }
 0x44a   : > { %v1153_v6 = vsel %vm820_vm4, %v1147_v5, -inf }
 0x44b   : > { %1154 = vmax.xlane.f32.xlu0 %v1153_v6  ;;  %v2813_v7 = vpop.f32.mrf.mxu0 }
 0x44d   : > { %v1150_v8 = vpop.f32.mrf.mxu0 }
 0x44f   : > { %v2814_v10 = vpop.f32.mrf.mxu0 }
 0x4bc   : > { %v823_v11 = vpop.xlane.xlu1 %822 }
 0x4bd   : > { %v824_v12 = vsub.f32 %v814_v53, %v823_v11 }
 0x4bf   : > { %v825_v13 = vmul.f32 1.442695, %v824_v12 }
 0x4c1   : > { %3034 = vpow2.f32 %v825_v13 }
 0x4c4   : > { %v934_v14 = vpop.xlane.xlu0 %933 }
 0x4c5   : > { %v935_v15 = vsub.f32 %v926_v58, %v934_v14 }
 0x4c7   : > { %v936_v16 = vmul.f32 1.442695, %v935_v15 }
 0x4c9   : > { %3036 = vpow2.f32 %v936_v16 }
 0x4cc   : > { %v1045_v27 = vpop.xlane.xlu1 %1044 }
 0x4cd   : > { %v1046_v28 = vsub.f32 %v1037_v63, %v1045_v27  ;;  %v3007_v63 = vld [vmem:[%s3758_s8 + $0x10] sm:$0xff]  }
 0x4ce   : > { %v3035_v17 = vpop.eup %3034  ;;  %2824 = vmatpush3.bf16.msra.mxu0 %v3007_v63  ;;  %v2624_v63 = vld [vmem:[%s3765_s15] ss:$0 sm:$0xff] }
 0x4cf   : > { %v827_v18 = vsel %vm820_vm4, %v3035_v17, 0.0  ;;  %v1047_v29 = vmul.f32 1.442695, %v1046_v28  ;;  %2825 = vmatprep.subr.bf16.mxu0 %v3155_v1 }
 0x4d0   : > { %828 = vadd.xlane.f32.xlu1 %v827_v18 }
 0x4d2   : > { %2826 = vmatpush3.bf16.msra.mxu0 %v3008_v0 }
 0x4d3   : > { %2827 = vmatprep.subr.bf16.mxu0 %v3155_v1 }
 0x4d4   : > { %v1155_v19 = vpop.xlane.xlu0 %1154 }
 0x4d5   : > { %v1156_v20 = vsub.f32 %v1147_v5, %v1155_v19  ;;  %v2612_v19 = vld [vmem:[%s3759_s9] ss:$0 sm:$0xff] }
 0x4d6   : > { %v3037_v22 = vpop.eup %3036  ;;  %2828 = vmatpush3.bf16.msra.mxu0 %v3009_v2 }
 0x4d7   : > { %v1157_v23 = vmul.f32 1.442695, %v1156_v20  ;;  %v938_v24 = vsel %vm820_vm4, %v3037_v22, 0.0 }
 0x4d8   : > { %939 = vadd.xlane.f32.xlu0 %v938_v24 }
 0x4d9   : > { %3038 = vpow2.f32 %v1157_v23 }
 0x4da   : > { %3040 = vpow2.f32 %v1047_v29 }
 0x4e1   : > { %945 = vrot.lane.b32.xlu1 %v3372_v38, %s3778_s0  ;;  %s3804_s0 = sld [smem:[#allocation17_spill]] }
 0x4e6   : > { %v3039_v25 = vpop.eup %3038 }
 0x4e7   : > { %v1159_v26 = vsel %vm820_vm4, %v3039_v25, 0.0  ;;  %v3041_v30 = vpop.eup %3040 }
 0x4e8   : > { %1160 = vadd.xlane.f32.xlu0 %v1159_v26  ;;  %v1049_v31 = vsel %vm820_vm4, %v3041_v30, 0.0 }
 0x4fe   : > { %1055 = vrot.lane.b32.xlu0 %v3372_v38, %s3784_s29  ;;  %s3805_s29 = smov 96  }
 0x505   : > { %1050 = vadd.xlane.f32.xlu1 %v1049_v31 }
 0x516   : > { %1165 = vrot.lane.b32.xlu1 %v3372_v38, %s3776_s22  ;;  %s3809_s22 = smov 16  }
 0x559   : > { %v829_v32 = vpop.xlane.xlu1 %828 }
 0x55a   : > { %3042 = vrcp.f32 %v829_v32  ;;  %v3010_v32 = vld [vmem:[%s3762_s12 + $0x8] sm:$0xff]  }
 0x55d   : > { %v946_v36 = vpop.permute.xlu1 %945 }
 0x55e   : > { %v951_v39 = vsel %vm837_vm3, %v946_v36, 0 }
 0x561   : > { %v940_v33 = vpop.xlane.xlu0 %939 }
 0x562   : > { %3044 = vrcp.f32 %v940_v33 }
 0x567   : > { %v3043_v34 = vpop.eup %3042 }
 0x568   : > { %v831_v35 = vmul.f32 %v3043_v34, %v3035_v17 }
 0x56a   : > { %v832_v37 = vpack.c.bf16 %v831_v35, %v831_v35 }
 0x56c   : > { %2782 = vmatmul.mubr.msk.bf16.vlgmr.msra.gmra.mxu1 %vm820_vm4, %v832_v37  ;;  %v2618_v37 = vld [vmem:[%s3760_s10] ss:$0 sm:$0xff] }
 0x56d   : > { %2792 = vmatpush3.bf16.msra.mxu1 %v951_v39  ;;  %2793 = vmatprep.mubr.msk.bf16.mxu1 %vm3156_vm0, %v3155_v1 }
 0x56e   : > { %2803 = vmatprep.subr.bf16.mxu1 %v3155_v1 }
 0x56f   : > { %v3045_v40 = vpop.eup %3044 }
 0x570   : > { %v942_v38 = vmul.f32 %v3045_v40, %v3037_v22  ;;  %v2619_v40 = vld [vmem:[%s3761_s11] ss:$0 sm:$0xff] }
 0x571   : > { %v1161_v41 = vpop.xlane.xlu0 %1160 }
 0x572   : > { %v943_v42 = vpack.c.bf16 %v942_v38, %v942_v38 }
 0x574   : > { %2794 = vmatmul.mubr.msk.bf16.vlgmr.msra.gmra.mxu1 %vm820_vm4, %v943_v42 }
 0x575   : > { %v1056_v43 = vpop.permute.xlu0 %1055  ;;  %2805 = vmatprep.mubr.msk.bf16.mxu1 %vm3156_vm0, %v3155_v1 }
 0x576   : > { %v1061_v44 = vsel %vm837_vm3, %v1056_v43, 0  ;;  %v3012_v43 = vld [vmem:[%s3764_s14 + $0x18] sm:$0xff]  }
 0x577   : > { %2804 = vmatpush3.bf16.msra.mxu1 %v1061_v44  ;;  %v3013_v44 = vld [vmem:[%s3764_s14 + $0x10] sm:$0xff]  }
 0x578   : > { %2815 = vmatprep.subr.bf16.mxu1 %v3155_v1 }
 0x58e   : > { %v1051_v45 = vpop.xlane.xlu1 %1050 }
 0x58f   : > { %3046 = vrcp.f32 %v1051_v45  ;;  %v3014_v45 = vld [vmem:[%s3764_s14 + $0x8] sm:$0xff]  }
 0x590   : > { %3048 = vrcp.f32 %v1161_v41 }
 0x592   : > { %v1166_v48 = vpop.permute.xlu1 %1165 }
 0x593   : > { %v1171_v51 = vsel %vm837_vm3, %v1166_v48, 0 }
 0x59c   : > { %v3047_v46 = vpop.eup %3046 }
 0x59d   : > { %v1053_v47 = vmul.f32 %v3047_v46, %v3041_v30  ;;  %v3049_v50 = vpop.eup %3048  ;;  %v3015_v46 = vld [vmem:[%s3764_s14] sm:$0xff]  }
 0x59e   : > { %v1163_v52 = vmul.f32 %v3049_v50, %v3039_v25 }
 0x59f   : > { %v1054_v49 = vpack.c.bf16 %v1053_v47, %v1053_v47  ;;  %v2620_v47 = vld [vmem:[%s3804_s0] ss:$0 sm:$0xff] }
 0x5a0   : > { %v1164_v53 = vpack.c.bf16 %v1163_v52, %v1163_v52 }
 0x5a1   : > { %2806 = vmatmul.mubr.msk.bf16.vlgmr.msra.gmra.mxu1 %vm820_vm4, %v1054_v49 }
 0x5a2   : > { %2816 = vmatpush3.bf16.msra.mxu1 %v1171_v51  ;;  %2817 = vmatprep.mubr.msk.bf16.mxu1 %vm3156_vm0, %v3155_v1 }
 0x5a3   : > { %2833 = vmatprep.subr.bf16.mxu1 %v3155_v1 }
 0x5a9   : > { %2818 = vmatmul.mubr.msk.bf16.vlgmr.msra.gmra.mxu1 %vm820_vm4, %v1164_v53 }
 0x5aa   : > { %2837 = vmatprep.mubr.msk.bf16.mxu1 %vm3156_vm0, %v3155_v1  ;;  %2834 = vmatpush3.bf16.msra.mxu1 %v3010_v32 }
 0x5ab   : > { %2835 = vmatprep.subr.bf16.mxu1 %v3155_v1 }
 0x62c   : > { %v875_v55 = vpop.f32.mrf.mxu1 }
 0x62e   : > { %v2783_v56 = vpop.f32.mrf.mxu1 }
 0x630   : > { %v878_v57 = vpop.f32.mrf.mxu1 }
 0x632   : > { %v2784_v58 = vpop.f32.mrf.mxu1 }
 0x634   : > { %v987_v59 = vpop.f32.mrf.mxu1 }
 0x635   : > { %1214 = vrot.lane.b32.xlu1 %v987_v59, %s3780_s30  ;;  %s3808_s30 = smov 32  }
 0x636   : > { %v2795_v60 = vpop.f32.mrf.mxu1 }
 0x638   : > { %v990_v61 = vpop.f32.mrf.mxu1 }
 0x63a   : > { %v2796_v62 = vpop.f32.mrf.mxu1 }
 0x661   : > { %v1097_v3 = vpop.f32.mrf.mxu1 }
 0x662   : > { %1218 = vrot.lane.b32.xlu0 %v1097_v3, %s3782_s28  ;;  %s3807_s28 = smov 80  }
 0x663   : > { %v2807_v4 = vpop.f32.mrf.mxu1 }
 0x665   : > { %v1100_v5 = vpop.f32.mrf.mxu1 }
 0x667   : > { %v2808_v6 = vpop.f32.mrf.mxu1 }
 0x669   : > { %v1207_v7 = vpop.f32.mrf.mxu1 }
 0x66a   : > { %1222 = vrot.lane.b32.xlu1 %v1207_v7, %s3160_s1 }
 0x66b   : > { %v2819_v8 = vpop.f32.mrf.mxu1 }
 0x66d   : > { %v1210_v10 = vpop.f32.mrf.mxu1 }
 0x66f   : > { %v2820_v11 = vpop.f32.mrf.mxu1 }
 0x6a7   : > { %v1215_v12 = vpop.permute.xlu1 %1214 }
 0x6a8   : > { %v1225_v14 = vsel %vm622_vm1, %v875_v55, %v1215_v12 }
 0x6d4   : > { %v1219_v13 = vpop.permute.xlu0 %1218 }
 0x6d5   : > { %v1226_v15 = vsel %vm670_vm2, %v1225_v14, %v1219_v13  ;;  %v3018_v14 = vld [vmem:[%s3757_s7 + $0x34] ss:$8 sps:$4 sm:$0xff]  }
 0x6d6   : > { %1575 = vmatprep.subr.bf16.mxu0 %v3018_v14 }
 0x6dc   : > { %v1223_v16 = vpop.permute.xlu1 %1222 }
 0x6dd   : > { %v1228_v17 = vsel %vm1227_vm5, %v1226_v15, %v1223_v16  ;;  %v3016_v15 = vld [vmem:[%s3757_s7 + $0x30] ss:$8 sps:$4 sm:$0xff]   ;;  %v3021_v16 = vld [vmem:[%s3757_s7 + $0x24] ss:$8 sps:$4 sm:$0xff]  }
 0x6de   : > { %v1229_v18 = vpack.c.bf16 %v1228_v17, %v1228_v17  ;;  %v3019_v17 = vld [vmem:[%s3757_s7 + $0x20] ss:$8 sps:$4 sm:$0xff]  }
 0x6e0   : > { %2830 = vmatmul.mubr.msk.bf16.vlgmr.msra.gmra.mxu0 %vm1269_vm6, %v1229_v18 }
 0x6e1   : > { %1595 = vmatprep.mubr.bf16.mxu0 %v3157_v21  ;;  %1576 = vmatpush1.bf16.msra.mxu0 %v3016_v15 }
 0x6e2   : > { %1577 = vmatprep.subr.bf16.mxu0 %v3021_v16 }
 0x6e5   : > { %1578 = vmatpush1.bf16.msra.mxu0 %v3019_v17 }
 0x6e6   : > { %2853 = vmatprep.subr.bf16.mxu0 %v3155_v1 }
 0x7a0   : > { %v1307_v20 = vpop.f32.mrf.mxu0 }
 0x7a1   : > { %v1308_v22 = vadd.f32 %v2612_v19, %v1307_v20 }
 0x7a2   : > { %v2831_v23 = vpop.f32.mrf.mxu0 }
 0x7a3   : > { %v3463_v24 = vadd.f32 %v1308_v22, %v3343_v9  ;;  %v3011_v9 = vld [vmem:[%s3762_s12] sm:$0xff]  }
 0x7a4   : > { %v1310_v25 = vpop.f32.mrf.mxu0  ;;  %2836 = vmatpush3.bf16.msra.mxu1 %v3011_v9  ;;  %v2632_v23 = vld [vmem:[%s3755_s5 + $0x1] ss:$0 sm:$0xff] }
 0x7a5   : > { %v1316_v26 = vsel %vm670_vm2, %v3463_v24, 0.0  ;;  %2841 = vmatprep.subr.bf16.mxu1 %v3155_v1  ;;  %v2633_v25 = vld [vmem:[%s3756_s6 + $0x1] ss:$0 sm:$0xff] }
 0x7a6   : > { %1317 = vadd.xlane.f32.xlu0 %v1316_v26  ;;  %v2832_v27 = vpop.f32.mrf.mxu0 }
 0x82f   : > { %v1318_v28 = vpop.xlane.xlu0 %1317 }
 0x830   : > { %v1319_v29 = vmul.f32 0.03125, %v1318_v28 }
 0x832   : > { %v1320_v21 = vsub.f32 %v3463_v24, %v1319_v29 }
 0x834   : > { %v1321_v30 = vmul.f32 %v1320_v21, %v1320_v21 }
 0x836   : > { %v1322_v31 = vsel %vm670_vm2, %v1321_v30, 0.0 }
 0x837   : > { %1323 = vadd.xlane.f32.xlu1 %v1322_v31 }
 0x8c0   : > { %v1324_v33 = vpop.xlane.xlu1 %1323 }
 0x8c1   : > { %v1325_v34 = vmul.f32 0.03125, %v1324_v33 }
 0x8c3   : > { %v1326_v35 = vadd.f32 1e-05, %v1325_v34 }
 0x8c5   : > { %3050 = vrsqrt.f32 %v1326_v35 }
 0x8d2   : > { %v3051_v36 = vpop.eup %3050 }
 0x8d3   : > { %v1328_v39 = vmul.f32 %v3051_v36, %v1320_v21 }
 0x8d5   : > { %v1335_v38 = vmul.f32 %v2618_v37, %v1328_v39 }
 0x8d7   : > { %v1342_v41 = vadd.f32 %v2619_v40, %v1335_v38 }
 0x8d9   : > { %v1343_v42 = vpack.c.bf16 %v1342_v41, %v1342_v41 }
 0x8db   : > { %2838 = vmatmul.mubr.msk.bf16.vlgmr.msra.gmra.mxu1 %vm670_vm2, %v1343_v42 }
 0x8dc   : > { %2849 = vmatprep.mubr.msk.bf16.mxu1 %vm3156_vm0, %v3155_v1  ;;  %2842 = vmatpush3.bf16.msra.mxu1 %v3012_v43 }
 0x8dd   : > { %2843 = vmatprep.subr.bf16.mxu1 %v3155_v1 }
 0x8e0   : > { %2844 = vmatpush3.bf16.msra.mxu1 %v3013_v44 }
 0x8e1   : > { %2845 = vmatprep.subr.bf16.mxu1 %v3155_v1 }
 0x8e4   : > { %2846 = vmatpush3.bf16.msra.mxu1 %v3014_v45 }
 0x8e5   : > { %2847 = vmatprep.subr.bf16.mxu1 %v3155_v1 }
 0x8e8   : > { %2848 = vmatpush3.bf16.msra.mxu1 %v3015_v46 }
 0x8e9   : > { %2859 = vmatprep.subr.bf16.mxu1 %v3155_v1 }
 0x99b   : > { %v1404_v48 = vpop.f32.mrf.mxu1 }
 0x99c   : > { %v1405_v49 = vadd.f32 %v2620_v47, %v1404_v48 }
 0x99d   : > { %v2839_v50 = vpop.f32.mrf.mxu1 }
 0x99e   : > { %v1411_v51 = vmul.f32 0.044715, %v1405_v49  ;;  %v1410_v59 = vmul.f32 0.5, %v1405_v49 }
 0x99f   : > { %v1407_v52 = vpop.f32.mrf.mxu1 }
 0x9a0   : > { %v1412_v53 = vmul.f32 %v1411_v51, %v1405_v49 }
 0x9a1   : > { %v2840_v54 = vpop.f32.mrf.mxu1 }
 0x9a2   : > { %v1413_v55 = vmul.f32 %v1412_v53, %v1405_v49 }
 0x9a4   : > { %v1414_v56 = vadd.f32 %v1413_v55, %v1405_v49 }
 0x9a6   : > { %v1415_v57 = vmul.f32 0.7978846, %v1414_v56 }
 0x9a8   : > { %3052 = vtanh.f32 %v1415_v57 }
 0x9b5   : > { %v3053_v58 = vpop.eup %3052 }
 0x9b6   : > { %v1417_v60 = vadd.f32 1.0, %v3053_v58 }
 0x9b8   : > { %v1418_v61 = vmul.f32 %v1417_v60, %v1410_v59 }
 0x9ba   : > { %v1419_v62 = vpack.c.bf16 %v1418_v61, %v1418_v61 }
 0x9bc   : > { %2850 = vmatmul.mubr.msk.bf16.vlgmr.msra.gmra.mxu1 %vm1269_vm6, %v1419_v62 }
 0x9bd   : > { %2861 = vmatprep.mubr.msk.bf16.mxu1 %vm3156_vm0, %v3155_v1 }
 0xa7c   : > { %v1496_v0 = vpop.f32.mrf.mxu1 }
 0xa7d   : > { %v1497_v2 = vadd.f32 %v2624_v63, %v1496_v0 }
 0xa7e   : > { %v2851_v3 = vpop.f32.mrf.mxu1 }
 0xa7f   : > { %v3512_v4 = vadd.f32 %v1497_v2, %v3463_v24 }
 0xa80   : > { %v1499_v5 = vpop.f32.mrf.mxu1 }
 0xa81   : > { %v1507_v6 = vsel %vm670_vm2, %v3512_v4, 0.0 }
 0xa82   : > { %1508 = vadd.xlane.f32.xlu0 %v1507_v6  ;;  %v2852_v7 = vpop.f32.mrf.mxu1 }
 0xb0b   : > { %v1509_v8 = vpop.xlane.xlu0 %1508 }
 0xb0c   : > { %v1510_v10 = vmul.f32 0.03125, %v1509_v8 }
 0xb0e   : > { %v1511_v11 = vsub.f32 %v3512_v4, %v1510_v10 }
 0xb10   : > { %v1512_v12 = vmul.f32 %v1511_v11, %v1511_v11 }
 0xb12   : > { %v1513_v13 = vsel %vm670_vm2, %v1512_v12, 0.0 }
 0xb13   : > { %1514 = vadd.xlane.f32.xlu0 %v1513_v13 }
 0xb9c   : > { %v1515_v18 = vpop.xlane.xlu0 %1514 }
 0xb9d   : > { %v1516_v19 = vmul.f32 0.03125, %v1515_v18 }
 0xb9f   : > { %v1517_v20 = vadd.f32 1e-05, %v1516_v19 }
 0xba1   : > { %3054 = vrsqrt.f32 %v1517_v20 }
 0xbae   : > { %v3055_v22 = vpop.eup %3054 }
 0xbaf   : > { %v1519_v24 = vmul.f32 %v3055_v22, %v1511_v11 }
 0xbb1   : > { %v1526_v26 = vmul.f32 %v2632_v23, %v1519_v24 }
 0xbb3   : > { %v1533_v27 = vadd.f32 %v2633_v25, %v1526_v26 }
 0xbb5   : > { %v1534_v28 = vpack.c.bf16 %v1533_v27, %v1533_v27 }
 0xbb7   : > { %2642 = vmatmul.mubr.msk.bf16.vlgmr.msra.gmra.mxu0 %vm670_vm2, %v1534_v28 }
 0xbb8   : > { %2855 = vmatprep.mubr.msk.bf16.mxu0 %vm3156_vm0, %v3155_v1 }
 0xc77   : > { %v1597_v29 = vpop.f32.mrf.mxu0 }
 0xc78   : > { %v1604_v21 = vmul.f32 0.25, %v1597_v29  ;;  %v1606_v30 = vpack.c.bf16 %v1597_v29, %v1597_v29 }
 0xc79   : > { %v1599_v31 = vpop.f32.mrf.mxu0 }
 0xc7a   : > { %v3540_v32 = vpack.c.bf16 %v1599_v31, %v1599_v31  ;;  %1718 = vrot.lane.b32.xlu0 %v1606_v30, %s3160_s1  ;;  %1608 = vrot.lane.b32.xlu1 %v1606_v30, %s3158_s4  ;;  %v1605_v33 = vpack.c.bf16 %v1604_v21, %v1604_v21 }
 0xc7b   : > { %v1601_v9 = vpop.f32.mrf.mxu0 }
 0xc7c   : > { %v1673_v34 = vsel %vm837_vm3, %v3540_v32, 0 }
 0xc7d   : > { %v1602_v35 = vpop.f32.mrf.mxu0  ;;  %2860 = vmatpush3.bf16.msra.mxu1 %v1673_v34 }
 0xc7e   : > { %1827 = vrot.lane.b32.xlu0 %v1605_v33, %s3805_s29  ;;  %1716 = vrot.lane.b32.xlu1 %v1605_v33, %s3806_s24 }
 0xc7f   : > { %2871 = vmatprep.subr.bf16.mxu1 %v3155_v1 }
 0xc82   : > { %1937 = vrot.lane.b32.xlu0 %v1605_v33, %s3807_s28  ;;  %1829 = vrot.lane.b32.xlu1 %v1606_v30, %s3808_s30 }
 0xc86   : > { %1939 = vrot.lane.b32.xlu1 %v1606_v30, %s3809_s22 }
 0xcec   : > { %v1609_v36 = vpop.permute.xlu1 %1608  ;;  %v1719_v39 = vpop.permute.xlu0 %1718 }
 0xced   : > { %v1614_v37 = vsel %vm622_vm1, %v1609_v36, 0  ;;  %v1724_v38 = vsel %vm622_vm1, %v1719_v39, 0 }
 0xcee   : > { %2854 = vmatpush3.bf16.xpose.msra.mxu0 %v1614_v37 }
 0xcef   : > { %2865 = vmatprep.subr.bf16.mxu0 %v3155_v1 }
 0xcf0   : > { %v1717_v40 = vpop.permute.xlu1 %1716  ;;  %v1828_v44 = vpop.permute.xlu0 %1827 }
 0xcf4   : > { %v1830_v41 = vpop.permute.xlu1 %1829  ;;  %v1938_v46 = vpop.permute.xlu0 %1937 }
 0xcf5   : > { %2856 = vmatmul.mubr.msk.bf16.vlgmr.msra.gmra.mxu0 %vm622_vm1, %v1605_v33  ;;  %v1835_v42 = vsel %vm622_vm1, %v1830_v41, 0 }
 0xcf6   : > { %2866 = vmatpush3.bf16.xpose.msra.mxu0 %v1724_v38  ;;  %2867 = vmatprep.mubr.msk.bf16.mxu0 %vm3156_vm0, %v3155_v1 }
 0xcf7   : > { %2877 = vmatprep.subr.bf16.mxu0 %v3155_v1 }
 0xcf8   : > { %v1940_v43 = vpop.permute.xlu1 %1939 }
 0xcf9   : > { %v1945_v45 = vsel %vm622_vm1, %v1940_v43, 0 }
 0xcfd   : > { %2868 = vmatmul.mubr.msk.bf16.vlgmr.msra.gmra.mxu0 %vm622_vm1, %v1717_v40 }
 0xcfe   : > { %2878 = vmatpush3.bf16.xpose.msra.mxu0 %v1835_v42  ;;  %2879 = vmatprep.mubr.msk.bf16.mxu0 %vm3156_vm0, %v3155_v1 }
 0xcff   : > { %2889 = vmatprep.subr.bf16.mxu0 %v3155_v1 }
 0xd05   : > { %2880 = vmatmul.mubr.msk.bf16.vlgmr.msra.gmra.mxu0 %vm622_vm1, %v1828_v44 }
 0xd06   : > { %2890 = vmatpush3.bf16.xpose.msra.mxu0 %v1945_v45  ;;  %2891 = vmatprep.mubr.msk.bf16.mxu0 %vm3156_vm0, %v3155_v1 }
 0xd07   : > { %2901 = vmatprep.subr.bf16.mxu0 %v3155_v1 }
 0xd0d   : > { %2892 = vmatmul.mubr.msk.bf16.vlgmr.msra.gmra.mxu0 %vm622_vm1, %v1938_v46 }
 0xd0e   : > { %2909 = vmatprep.mubr.msk.bf16.mxu0 %vm3156_vm0, %v3155_v1 }
 0xdb5   : > { %v1650_v47 = vpop.f32.mrf.mxu0 }
 0xdb6   : > { %v1656_v48 = vsel %vm820_vm4, %v1650_v47, -inf }
 0xdb7   : > { %1657 = vmax.xlane.f32.xlu1 %v1656_v48  ;;  %v2857_v49 = vpop.f32.mrf.mxu0 }
 0xdb9   : > { %v1653_v50 = vpop.f32.mrf.mxu0 }
 0xdba   : > { %v3022_v50 = vld [vmem:[%s3758_s8 + $0x38] sm:$0xff]  }
 0xdbb   : > { %v2858_v51 = vpop.f32.mrf.mxu0  ;;  %2902 = vmatpush3.bf16.msra.mxu0 %v3022_v50 }
 0xdbc   : > { %2903 = vmatprep.subr.bf16.mxu0 %v3155_v1 }
 0xdbd   : > { %v1760_v52 = vpop.f32.mrf.mxu0 }
 0xdbe   : > { %v1766_v53 = vsel %vm820_vm4, %v1760_v52, -inf }
 0xdbf   : > { %1767 = vmax.xlane.f32.xlu0 %v1766_v53  ;;  %v2869_v54 = vpop.f32.mrf.mxu0 }
 0xdc1   : > { %v1763_v55 = vpop.f32.mrf.mxu0 }
 0xdc2   : > { %v3024_v55 = vld [vmem:[%s3758_s8 + $0x28] sm:$0xff]  }
 0xdc3   : > { %v2870_v56 = vpop.f32.mrf.mxu0 }
 0xdc5   : > { %v1871_v57 = vpop.f32.mrf.mxu0 }
 0xdc6   : > { %v1877_v58 = vsel %vm820_vm4, %v1871_v57, -inf }
 0xdc7   : > { %1878 = vmax.xlane.f32.xlu0 %v1877_v58  ;;  %v2881_v59 = vpop.f32.mrf.mxu0 }
 0xdc9   : > { %v1874_v60 = vpop.f32.mrf.mxu0 }
 0xdcb   : > { %v2882_v61 = vpop.f32.mrf.mxu0 }
 0xdcd   : > { %v1981_v62 = vpop.f32.mrf.mxu0 }
 0xdce   : > { %v1987_v63 = vsel %vm820_vm4, %v1981_v62, -inf }
 0xdcf   : > { %1988 = vmax.xlane.f32.xlu1 %v1987_v63  ;;  %v2893_v0 = vpop.f32.mrf.mxu0 }
 0xdd1   : > { %v1984_v2 = vpop.f32.mrf.mxu0 }
 0xdd3   : > { %v2894_v3 = vpop.f32.mrf.mxu0 }
 0xe40   : > { %v1658_v5 = vpop.xlane.xlu1 %1657 }
 0xe41   : > { %v1659_v6 = vsub.f32 %v1650_v47, %v1658_v5 }
 0xe43   : > { %v1660_v7 = vmul.f32 1.442695, %v1659_v6 }
 0xe45   : > { %3056 = vpow2.f32 %v1660_v7 }
 0xe48   : > { %v1768_v8 = vpop.xlane.xlu0 %1767 }
 0xe49   : > { %v1769_v10 = vsub.f32 %v1760_v52, %v1768_v8  ;;  %v3023_v52 = vld [vmem:[%s3758_s8 + $0x30] sm:$0xff]  }
 0xe4a   : > { %2904 = vmatpush3.bf16.msra.mxu0 %v3023_v52 }
 0xe4b   : > { %v1770_v11 = vmul.f32 1.442695, %v1769_v10  ;;  %2905 = vmatprep.subr.bf16.mxu0 %v3155_v1 }
 0xe4d   : > { %3058 = vpow2.f32 %v1770_v11 }
 0xe4e   : > { %2906 = vmatpush3.bf16.msra.mxu0 %v3024_v55 }
 0xe4f   : > { %2907 = vmatprep.subr.bf16.mxu0 %v3155_v1 }
 0xe50   : > { %v1879_v12 = vpop.xlane.xlu0 %1878 }
 0xe51   : > { %v1880_v13 = vsub.f32 %v1871_v57, %v1879_v12 }
 0xe52   : > { %v3057_v14 = vpop.eup %3056 }
 0xe53   : > { %v1881_v15 = vmul.f32 1.442695, %v1880_v13  ;;  %v1662_v16 = vsel %vm820_vm4, %v3057_v14, 0.0  ;;  %v2660_v13 = vld [vmem:[%s3759_s9 + $0x1] ss:$0 sm:$0xff] }
 0xe54   : > { %1663 = vadd.xlane.f32.xlu0 %v1662_v16 }
 0xe55   : > { %3060 = vpow2.f32 %v1881_v15 }
 0xe58   : > { %v1989_v22 = vpop.xlane.xlu1 %1988 }
 0xe59   : > { %v1990_v23 = vsub.f32 %v1981_v62, %v1989_v22  ;;  %v3025_v62 = vld [vmem:[%s3758_s8 + $0x20] sm:$0xff]  }
 0xe5a   : > { %v3059_v17 = vpop.eup %3058  ;;  %2908 = vmatpush3.bf16.msra.mxu0 %v3025_v62 }
 0xe5b   : > { %v1772_v18 = vsel %vm820_vm4, %v3059_v17, 0.0  ;;  %v1991_v24 = vmul.f32 1.442695, %v1990_v23  ;;  %2933 = vmatprep.subr.mxu0 %v3155_v1 }
 0xe5c   : > { %1773 = vadd.xlane.f32.xlu1 %v1772_v18 }
 0xe5d   : > { %3062 = vpow2.f32 %v1991_v24 }
 0xe62   : > { %v3061_v19 = vpop.eup %3060 }
 0xe63   : > { %v1883_v20 = vsel %vm820_vm4, %v3061_v19, 0.0 }
 0xe64   : > { %1884 = vadd.xlane.f32.xlu0 %v1883_v20 }
 0xe6a   : > { %v3063_v25 = vpop.eup %3062 }
 0xe6b   : > { %v1993_v26 = vsel %vm820_vm4, %v3063_v25, 0.0 }
 0xe6d   : > { %1889 = vrot.lane.b32.xlu1 %v3540_v32, %s3805_s29 }
 0xe7a   : > { %1779 = vrot.lane.b32.xlu0 %v3540_v32, %s3806_s24 }
 0xe91   : > { %1994 = vadd.xlane.f32.xlu1 %v1993_v26 }
 0xea2   : > { %1999 = vrot.lane.b32.xlu1 %v3540_v32, %s3807_s28  ;;  %s2697_s28 = sshll.u32 %s3295_s13, 4 }
 0xea3   : > { %s3715_s2 = scalar_lea.hbm %s3770_s20, %s2697_s28 }
 0xedd   : > { %v1664_v27 = vpop.xlane.xlu0 %1663 }
 0xede   : > { %3064 = vrcp.f32 %v1664_v27  ;;  %v3026_v27 = vld [vmem:[%s3762_s12 + $0x18] sm:$0xff]  }
 0xee5   : > { %v1774_v28 = vpop.xlane.xlu1 %1773 }
 0xee6   : > { %3066 = vrcp.f32 %v1774_v28 }
 0xee9   : > { %v1890_v35 = vpop.permute.xlu1 %1889 }
 0xeea   : > { %v1895_v37 = vsel %vm837_vm3, %v1890_v35, 0 }
 0xeeb   : > { %v3065_v29 = vpop.eup %3064 }
 0xeec   : > { %v1666_v21 = vmul.f32 %v3065_v29, %v3057_v14 }
 0xeed   : > { %v1885_v30 = vpop.xlane.xlu0 %1884 }
 0xeee   : > { %3068 = vrcp.f32 %v1885_v30  ;;  %v1667_v31 = vpack.c.bf16 %v1666_v21, %v1666_v21 }
 0xef0   : > { %2862 = vmatmul.mubr.msk.bf16.vlgmr.msra.gmra.mxu1 %vm820_vm4, %v1667_v31  ;;  %v2668_v31 = vld [vmem:[%s3760_s10 + $0x1] ss:$0 sm:$0xff] }
 0xef1   : > { %v1780_v9 = vpop.permute.xlu0 %1779  ;;  %2873 = vmatprep.mubr.msk.bf16.mxu1 %vm3156_vm0, %v3155_v1 }
 0xef2   : > { %v1785_v33 = vsel %vm837_vm3, %v1780_v9, 0 }
 0xef3   : > { %v3067_v34 = vpop.eup %3066  ;;  %2872 = vmatpush3.bf16.msra.mxu1 %v1785_v33  ;;  %v2669_v33 = vld [vmem:[%s3761_s11 + $0x1] ss:$0 sm:$0xff] }
 0xef4   : > { %2883 = vmatprep.subr.bf16.mxu1 %v3155_v1  ;;  %v1776_v32 = vmul.f32 %v3067_v34, %v3059_v17 }
 0xef6   : > { %v1777_v36 = vpack.c.bf16 %v1776_v32, %v1776_v32 }
 0xef8   : > { %2874 = vmatmul.mubr.msk.bf16.vlgmr.msra.gmra.mxu1 %vm820_vm4, %v1777_v36  ;;  %v3028_v36 = vld [vmem:[%s3764_s14 + $0x38] sm:$0xff]  }
 0xef9   : > { %2884 = vmatpush3.bf16.msra.mxu1 %v1895_v37  ;;  %2885 = vmatprep.mubr.msk.bf16.mxu1 %vm3156_vm0, %v3155_v1  ;;  %v3029_v37 = vld [vmem:[%s3764_s14 + $0x30] sm:$0xff]  }
 0xefa   : > { %2895 = vmatprep.subr.bf16.mxu1 %v3155_v1 }
 0xefb   : > { %v3069_v39 = vpop.eup %3068 }
 0xefc   : > { %v1887_v40 = vmul.f32 %v3069_v39, %v3061_v19  ;;  %v3030_v39 = vld [vmem:[%s3764_s14 + $0x28] sm:$0xff]  }
 0xefe   : > { %v1888_v38 = vpack.c.bf16 %v1887_v40, %v1887_v40  ;;  %v3031_v40 = vld [vmem:[%s3764_s14 + $0x20] sm:$0xff]  }
 0xf00   : > { %2886 = vmatmul.mubr.msk.bf16.vlgmr.msra.gmra.mxu1 %vm820_vm4, %v1888_v38  ;;  %v2675_v38 = vld [vmem:[%s3804_s0 + $0x1] ss:$0 sm:$0xff] }
 0xf01   : > { %2897 = vmatprep.mubr.msk.bf16.mxu1 %vm3156_vm0, %v3155_v1 }
 0xf1a   : > { %v1995_v41 = vpop.xlane.xlu1 %1994 }
 0xf1b   : > { %3070 = vrcp.f32 %v1995_v41 }
 0xf1e   : > { %v2000_v42 = vpop.permute.xlu1 %1999 }
 0xf1f   : > { %v2005_v43 = vsel %vm837_vm3, %v2000_v42, 0 }
 0xf20   : > { %2896 = vmatpush3.bf16.msra.mxu1 %v2005_v43 }
 0xf21   : > { %2913 = vmatprep.subr.bf16.mxu1 %v3155_v1 }
 0xf28   : > { %v3071_v44 = vpop.eup %3070 }
 0xf29   : > { %v1997_v45 = vmul.f32 %v3071_v44, %v3063_v25 }
 0xf2b   : > { %v1998_v46 = vpack.c.bf16 %v1997_v45, %v1997_v45 }
 0xf2d   : > { %2898 = vmatmul.mubr.msk.bf16.vlgmr.msra.gmra.mxu1 %vm820_vm4, %v1998_v46 }
 0xf2e   : > { %2917 = vmatprep.mubr.msk.bf16.mxu1 %vm3156_vm0, %v3155_v1  ;;  %2914 = vmatpush3.bf16.msra.mxu1 %v3026_v27 }
 0xf2f   : > { %2915 = vmatprep.subr.bf16.mxu1 %v3155_v1 }
 0xfb0   : > { %v1709_v47 = vpop.f32.mrf.mxu1 }
 0xfb2   : > { %v2863_v48 = vpop.f32.mrf.mxu1 }
 0xfb4   : > { %v1712_v49 = vpop.f32.mrf.mxu1 }
 0xfb6   : > { %v2864_v51 = vpop.f32.mrf.mxu1 }
 0xfb8   : > { %v1821_v53 = vpop.f32.mrf.mxu1 }
 0xfb9   : > { %2048 = vrot.lane.b32.xlu0 %v1821_v53, %s3809_s22  ;;  %s599_s22 = scalar_lea.vmem [#allocation4], %s598_s23 }
 0xfba   : > { %v2875_v54 = vpop.f32.mrf.mxu1 }
 0xfbc   : > { %v1824_v56 = vpop.f32.mrf.mxu1 }
 0xfbd   : > { %v2344_v56 = vlaneseq }
 0xfbe   : > { %v2876_v57 = vpop.f32.mrf.mxu1 }
 0xfbf   : > { %v2345_v57 = vand.u32 127, %v2344_v56 }
 0xfc0   : > { %v1931_v58 = vpop.f32.mrf.mxu1 }
 0xfc1   : > { %2052 = vrot.lane.b32.xlu1 %v1931_v58, %s3808_s30  ;;  %s2343_s30 = sld [smem:[#allocation3 + %s3295_s13]]  ;;  %s3165_s13 = smov [#allocation4]  }
 0xfc2   : > { %v2887_v59 = vpop.f32.mrf.mxu1  ;;  %s3094_s29 = sshll.u32 %s3165_s13, 4  ;;  %s3095_s29 = int_to_ptr.vmem [resolvable:$false] %s3094_s29 }
 0xfc3   : > { %v2688_v59 = vld [vmem:[%s3765_s15 + $0x1] ss:$0 sm:$0xff]  ;;  %s3096_s24 = scalar_lea.vmem %s3095_s29, 32 }
 0xfc4   : > { %v1934_v60 = vpop.f32.mrf.mxu1 }
 0xfc6   : > { %v2888_v61 = vpop.f32.mrf.mxu1 }
 0xfc7   : > { %v2346_v58 = vstv %s2343_s30  ;;  %s2534_s30 = sshll.u32 %s599_s22, 4  ;;  %s2535_s30 = int_to_ptr.vmem [resolvable:$true] %s2534_s30 }
 0xfc8   : > { %vm2347_vm7 = vcmp.eq.s32.totalorder %v2345_v57, %v2346_v58  ;;  %s3090_s0 = scalar_lea.vmem %s2535_s30, 16  ;;  %p3097_p5 = scmp.lt.s32.totalorder %s2535_s30, %s3095_s29 }
 0xfc9   : > { %p3091_p2 = scmp.ne.s32.totalorder %s2535_s30, %s3090_s0  ;;  %p3098_p6 = scmp.lt.s32.totalorder %s3096_s24, %s3090_s0 }
 0xfcb   : > { %p3092_p3 = pnand %p3091_p2, %p3312_p10  ;;  %p3099_p7 = por %p3098_p6, %p3097_p5 }
 0xfcd   : > { %p3093_p4 = pneg %p3092_p3 }
 0xfcf   : > { %p3100_p8 = pnand %p3099_p7, %p3093_p4 }
 0xfed   : > { %v2041_v63 = vpop.f32.mrf.mxu1 }
 0xfee   : > { %2056 = vrot.lane.b32.xlu0 %v2041_v63, %s3160_s1 }
 0xfef   : > { %v2899_v0 = vpop.f32.mrf.mxu1 }
 0xff0   : > { %v2694_v0 = vsel %vm2347_vm7, 1.0, %v3155_v1 }
 0xff1   : > { %v2044_v2 = vpop.f32.mrf.mxu1 }
 0xff3   : > { %v2900_v3 = vpop.f32.mrf.mxu1 }
0x102b   : > { %v2049_v5 = vpop.permute.xlu0 %2048 }
0x102c   : > { %v2059_v7 = vsel %vm622_vm1, %v1709_v47, %v2049_v5 }
0x1033   : > { %v2053_v6 = vpop.permute.xlu1 %2052 }
0x1034   : > { %v2060_v8 = vsel %vm670_vm2, %v2059_v7, %v2053_v6 }
0x1060   : > { %v2057_v10 = vpop.permute.xlu0 %2056 }
0x1061   : > { %v2061_v11 = vsel %vm1227_vm5, %v2060_v8, %v2057_v10 }
0x1062   : > { %v2062_v12 = vpack.c.bf16 %v2061_v11, %v2061_v11 }
0x1064   : > { %2910 = vmatmul.mubr.msk.bf16.vlgmr.msra.gmra.mxu0 %vm1269_vm6, %v2062_v12 }
0x1065   : > { %2935 = vmatprep.mubr.msk.f32.mxu0 %vm3156_vm0, %v3155_v1 }
0x1124   : > { %v2141_v14 = vpop.f32.mrf.mxu0 }
0x1125   : > { %v2142_v15 = vadd.f32 %v2660_v13, %v2141_v14  ;;  %v2444_v14 = vld [vmem:[%s3768_s18 + $0x18] sm:$0xff] }
0x1126   : > { %v2911_v16 = vpop.f32.mrf.mxu0 }
0x1127   : > { %v3633_v17 = vadd.f32 %v2142_v15, %v3512_v4  ;;  %v3027_v4 = vld [vmem:[%s3762_s12 + $0x10] sm:$0xff]   ;;  %v2442_v16 = vld [vmem:[%s3768_s18 + $0x8] sm:$0xff] }
0x1128   : > { %v2144_v18 = vpop.f32.mrf.mxu0  ;;  %2916 = vmatpush3.bf16.msra.mxu1 %v3027_v4  ;;  %v2443_v15 = vld [vmem:[%s3768_s18 + $0x10] sm:$0xff] }
0x1129   : > { %v2152_v19 = vsel %vm670_vm2, %v3633_v17, 0.0  ;;  %2921 = vmatprep.subr.bf16.mxu1 %v3155_v1 }
0x112a   : > { %2153 = vadd.xlane.f32.xlu1 %v2152_v19  ;;  %v2912_v20 = vpop.f32.mrf.mxu0 }
0x11b3   : > { %v2154_v22 = vpop.xlane.xlu1 %2153 }
0x11b4   : > { %v2155_v23 = vmul.f32 0.03125, %v2154_v22 }
0x11b6   : > { %v2156_v24 = vsub.f32 %v3633_v17, %v2155_v23  ;;  %v2423_v23 = vld [vmem:[%s3766_s16] sm:$0x1] }
0x11b8   : > { %v2157_v25 = vmul.f32 %v2156_v24, %v2156_v24 }
0x11ba   : > { %v2158_v26 = vsel %vm670_vm2, %v2157_v25, 0.0  ;;  %v2424_v25 = vld [vmem:[%s3767_s17] sm:$0x1] }
0x11bb   : > { %2159 = vadd.xlane.f32.xlu0 %v2158_v26 }
0x1244   : > { %v2160_v28 = vpop.xlane.xlu0 %2159 }
0x1245   : > { %v2161_v29 = vmul.f32 0.03125, %v2160_v28 }
0x1247   : > { %v2162_v21 = vadd.f32 1e-05, %v2161_v29 }
0x1249   : > { %3072 = vrsqrt.f32 %v2162_v21 }
0x1256   : > { %v3073_v30 = vpop.eup %3072 }
0x1257   : > { %v2164_v9 = vmul.f32 %v3073_v30, %v2156_v24 }
0x1259   : > { %v2171_v34 = vmul.f32 %v2668_v31, %v2164_v9 }
0x125b   : > { %v2178_v32 = vadd.f32 %v2669_v33, %v2171_v34 }
0x125d   : > { %v2179_v35 = vpack.c.bf16 %v2178_v32, %v2178_v32 }
0x125f   : > { %2918 = vmatmul.mubr.msk.bf16.vlgmr.msra.gmra.mxu1 %vm670_vm2, %v2179_v35 }
0x1260   : > { %2929 = vmatprep.mubr.msk.bf16.mxu1 %vm3156_vm0, %v3155_v1  ;;  %2922 = vmatpush3.bf16.msra.mxu1 %v3028_v36 }
0x1261   : > { %2923 = vmatprep.subr.bf16.mxu1 %v3155_v1 }
0x1264   : > { %2924 = vmatpush3.bf16.msra.mxu1 %v3029_v37 }
0x1265   : > { %2925 = vmatprep.subr.bf16.mxu1 %v3155_v1 }
0x1268   : > { %2926 = vmatpush3.bf16.msra.mxu1 %v3030_v39 }
0x1269   : > { %2927 = vmatprep.subr.bf16.mxu1 %v3155_v1 }
0x126c   : > { %2928 = vmatpush3.bf16.msra.mxu1 %v3031_v40 }
0x131f   : > { %v2242_v41 = vpop.f32.mrf.mxu1 }
0x1320   : > { %v2243_v42 = vadd.f32 %v2675_v38, %v2242_v41 }
0x1321   : > { %v2919_v43 = vpop.f32.mrf.mxu1 }
0x1322   : > { %v2249_v44 = vmul.f32 0.044715, %v2243_v42  ;;  %v2248_v52 = vmul.f32 0.5, %v2243_v42 }
0x1323   : > { %v2245_v45 = vpop.f32.mrf.mxu1 }
0x1324   : > { %v2250_v46 = vmul.f32 %v2249_v44, %v2243_v42 }
0x1325   : > { %v2920_v47 = vpop.f32.mrf.mxu1 }
0x1326   : > { %v2251_v48 = vmul.f32 %v2250_v46, %v2243_v42 }
0x1328   : > { %v2252_v49 = vadd.f32 %v2251_v48, %v2243_v42 }
0x132a   : > { %v2253_v50 = vmul.f32 0.7978846, %v2252_v49 }
0x132c   : > { %3074 = vtanh.f32 %v2253_v50 }
0x1339   : > { %v3075_v51 = vpop.eup %3074 }
0x133a   : > { %v2255_v53 = vadd.f32 1.0, %v3075_v51 }
0x133c   : > { %v2256_v54 = vmul.f32 %v2255_v53, %v2248_v52 }
0x133e   : > { %v2257_v55 = vpack.c.bf16 %v2256_v54, %v2256_v54 }
0x1340   : > { %2930 = vmatmul.mubr.msk.bf16.vlgmr.msra.gmra.mxu1 %vm1269_vm6, %v2257_v55 }
0x1400   : > { %v2336_v60 = vpop.f32.mrf.mxu1 }
0x1401   : > { %v2337_v61 = vadd.f32 %v2688_v59, %v2336_v60 }
0x1402   : > { %v2931_v62 = vpop.f32.mrf.mxu1 }
0x1403   : > { %v2342_v63 = vadd.f32 %v2337_v61, %v3633_v17  ;;  %v2441_v17 = vld [vmem:[%s3768_s18] sm:$0xff] }
0x1404   : > { %v2339_v2 = vpop.f32.mrf.mxu1 }
0x1405   : > { %2934 = vmatpush3.msra.mxu0 %v2342_v63 }
0x1406   : > { %v2932_v3 = vpop.f32.mrf.mxu1  ;;  %2936 = vmatmul.mubr.msk.f32.vlgmr.msra.gmra.mxu0 %vm820_vm4, %v2694_v0  ;;  %2938 = vmatprep.subr.mxu0 %v3155_v1 }
0x1407   : > { %2946 = vmatprep.mubr.msk.f32.mxu0 %vm3156_vm0, %v3155_v1  ;;  %2939 = vmatpush3.msra.mxu0 %v2444_v14 }
0x1408   : > { %2940 = vmatprep.subr.mxu0 %v3155_v1 }
0x1409   : > { %2941 = vmatpush3.msra.mxu0 %v2443_v15 }
0x140a   : > { %2942 = vmatprep.subr.mxu0 %v3155_v1 }
0x140b   : > { %2943 = vmatpush3.msra.mxu0 %v2442_v16 }
0x140c   : > { %2944 = vmatprep.subr.mxu0 %v3155_v1  ;;  %v2445_v1 = vld [vmem:[%s3769_s19] sm:$0x1] }
0x140d   : > { %2945 = vmatpush3.msra.mxu0 %v2441_v17 }
0x14c6   : > { %v2419_v5 = vpop.f32.mrf.mxu0 }
0x14c7   : > { %v2426_v6 = vsel %vm2425_vm8, %v2419_v5, 0.0 }
0x14c8   : > { %2427 = vadd.xlane.f32.xlu0 %v2426_v6  ;;  %v2937_v7 = vpop.f32.mrf.mxu0 }
0x1551   : > { %v2428_v8 = vpop.xlane.xlu0 %2427 }
0x1552   : > { %v2429_v10 = vmul.f32 0.03125, %v2428_v8 }
0x1554   : > { %v2430_v11 = vsub.f32 %v2419_v5, %v2429_v10 }
0x1556   : > { %v2431_v12 = vmul.f32 %v2430_v11, %v2430_v11 }
0x1558   : > { %v2432_v13 = vsel %vm2425_vm8, %v2431_v12, 0.0 }
0x1559   : > { %2433 = vadd.xlane.f32.xlu1 %v2432_v13 }
0x15e2   : > { %v2434_v18 = vpop.xlane.xlu1 %2433 }
0x15e3   : > { %v2435_v19 = vmul.f32 0.03125, %v2434_v18 }
0x15e5   : > { %v2436_v20 = vadd.f32 1e-05, %v2435_v19 }
0x15e7   : > { %3076 = vrsqrt.f32 %v2436_v20 }
0x15f4   : > { %v3077_v22 = vpop.eup %3076 }
0x15f5   : > { %v2438_v24 = vmul.f32 %v3077_v22, %v2430_v11 }
0x15f7   : > { %v2439_v26 = vmul.f32 %v2438_v24, %v2423_v23 }
0x15f9   : > { %v2440_v27 = vadd.f32 %v2439_v26, %v2424_v25 }
0x15fb   : > { %2947 = vmatmul.mubr.msk.f32.vlgmr.msra.gmra.mxu0 %vm670_vm2, %v2440_v27 }
0x16bb   : > { %v2515_v4 = vpop.f32.mrf.mxu0 }
0x16bc   : > { %v2516_v28 = vadd.f32 %v2515_v4, %v2445_v1 }
0x16bd   : > { %v2948_v29 = vpop.f32.mrf.mxu0 }
0x16be   : > { %2520 = vst.msk [vmem:[%s599_s22] sm:$0x1] %vm2519_vm9, %v2516_v28 }
0x16bf   : > { %3103 = shalt.err (!%p3100_p8)
}
0x16c0   : > { %s3104_s28 = scalar_lea.hbm %s3715_s2, 16  ;;  %s3108_s1 = scalar_lea.hbm %s3770_s20, 32 }
0x16c1   : > { %p3105_p9 = scmp.ne.s32.totalorder %s3715_s2, %s3104_s28  ;;  %p3109_p0 = scmp.lt.s32.totalorder %s3715_s2, %s3770_s20 }
0x16c2   : > { %p3110_p1 = scmp.lt.s32.totalorder %s3108_s1, %s3104_s28 }
0x16c3   : > { %p3106_p12 = pnand %p3105_p9, %p3312_p10 }
0x16c4   : > { %p3111_p2 = por %p3110_p1, %p3109_p0 }
0x16c5   : > { %p3107_p13 = pneg %p3106_p12 }
0x16c7   : > { %p3112_p3 = pnand %p3111_p2, %p3107_p13 }
0x16c9   : > { %3115 = shalt.err (!%p3112_p3)
}
0x16ca   : > { %2949 = dma.vmem_to_hbm [thread:$0]  (%p3312_p10), %s2535_s30, 16, %s3715_s2, %s2522_s26  }
0x16cb PF: > { %p2955_p4 = scmp.ge.s32.totalorder %s3152_s27, 2  ;;  %s2546_s29 = sand.u32 1, %s3140_s25  }
0x16cc   : > { %s2547_s24 = scalar_lea.sflag [#allocation5], %s2546_s29 }
0x16cd   : > { %p2952_p5 = pnand %p2955_p4, %p3316_p11 }
0x16cf   : > { %p2953_p6 = pneg %p2952_p5 }
0x16d1   : > { %3135 = dma.done.wait (%p2953_p6), %s2547_s24, 16  }
0x16d2   : > { %3137 = vsyncadd (%p2953_p6), %s2547_s24, 4294967280  ;;  %s3811_s27 = sld [smem:[#allocation9_spill]]  ;;  %s3814_s25 = smov %s3144_s3 }
0x16d3   : > { %s3812_s28 = sld [smem:[#allocation8_spill]] }
0x16d4   : > { %s3813_s26 = sld [smem:[#allocation10_spill]] }
0x16d8   : > { %p36_p7 = scmp.ge.s32.totalorder %s3811_s27, 4  }
0x16d9   : > { %s3815_s3 = smov %s3812_s28 }
0x16da   :  { %38 = sbr.rel (!%p36_p7) target bundleno = 30 (0x1e), region = 142 }
0x16df   :  { %2551 = vsyncpa [#allocation5], 1 }
0x16e0   :  { %2553 = vsyncpa [#allocation5 + $0x1], 1 }

</bundles_post_ra>
